<compile_context>
chip_gen: v7x
topology: tpu7x:2x2x1
jax: 0.10.0
libtpu: 0.0.40
codegen_flags: <defaults>
</compile_context>

<pallas_src>
import math

import jax
import jax.numpy as jnp
from jax import lax
from jax.experimental import pallas as pl
from jax.experimental.pallas import tpu as pltpu

# ---- small config consistent with GPTConfig usage in MinimalGPT ----
B = 2            # batch
T = 8            # sequence length used in the forward pass
BT = B * T       # 16 tokens processed together (batch folded into token axis)
E = 32           # n_embed
H = 4            # n_heads
D = E // H       # head_dim = 8 (even, as RoPE requires)
MLP_RATIO = 4
INNER = E * MLP_RATIO   # 128
V = 128          # vocab_size
N_LAYERS = 2
CTX_LEN = 16     # max_pos for rotary tables / causal buffer
LN_EPS = 1e-5    # torch.nn.LayerNorm default


# ----------------------------- in-kernel helpers -----------------------------
def _layernorm(x, gamma, beta):
    # one-pass statistics: sum and sum-of-squares issued back-to-back
    n = x.shape[-1]
    s1 = jnp.sum(x, axis=-1, keepdims=True)
    s2 = jnp.sum(x * x, axis=-1, keepdims=True)
    mu = s1 * (1.0 / n)
    var = s2 * (1.0 / n) - mu * mu
    return (x - mu) * lax.rsqrt(var + LN_EPS) * gamma + beta


def _gelu_exact(x):
    # F.gelu default = exact erf-based GELU
    return 0.5 * x * (1.0 + lax.erf(x * (1.0 / math.sqrt(2.0))))


# ------------------------------ fused Pallas kernel ---------------------------
def gpt_kernel(x_ref,
               g1_ref, b1_ref, wq_ref, wk_ref, wv_ref, wproj_ref,
               g2_ref, b2_ref, w1_ref, bias1_ref, w2_ref, bias2_ref,
               cos_ref, sin_ref, wswap_ref, abias_ref, gf_ref, bf_ref,
               wembt_ref, o_ref):
    """Single invocation: all N_LAYERS layers unrolled; weights fully VMEM-resident."""
    bf16 = jnp.bfloat16
    x = x_ref[...]                                            # (BT, E) f32
    cos = cos_ref[...]                                        # (BT, E) f32
    sin_s = sin_ref[...]                                      # (BT, E) f32, sign folded in
    wswap = wswap_ref[...]                                    # (E, E) bf16 pair-swap perm
    abias = abias_ref[...]                                    # (H*BT, BT) additive mask
    scale = 1.0 / math.sqrt(D)

    for l in range(N_LAYERS):                                 # static unroll
        # --- ln1 ---
        h = _layernorm(x, g1_ref[l], b1_ref[l])
        hb = h.astype(bf16)

        # --- attention: separate q/k/v matmuls (results land at lane 0) ---
        q = jnp.dot(hb, wq_ref[l], preferred_element_type=jnp.float32)
        k = jnp.dot(hb, wk_ref[l], preferred_element_type=jnp.float32)
        v = jnp.dot(hb, wv_ref[l], preferred_element_type=jnp.float32)

        # RoPE: x*C + (x @ P_swap)*S  (P_swap is an exact permutation)
        q = q * cos + jnp.dot(q.astype(bf16), wswap,
                              preferred_element_type=jnp.float32) * sin_s
        k = k * cos + jnp.dot(k.astype(bf16), wswap,
                              preferred_element_type=jnp.float32) * sin_s

        # scores for all heads, stacked along sublanes -> one (H*BT, BT) slab
        s_parts = []
        for hh in range(H):
            lo = hh * D
            qh = q[:, lo:lo + D].astype(bf16)
            kh = k[:, lo:lo + D].astype(bf16)
            s_parts.append(lax.dot_general(qh, kh, (((1,), (1,)), ((), ())),
                                           preferred_element_type=jnp.float32))
        s_all = jnp.concatenate(s_parts, axis=0) * scale + abias     # (H*BT, BT)

        # one batched softmax over the whole slab (EUP reciprocal)
        s_all = s_all - jnp.max(s_all, axis=-1, keepdims=True)
        p_all = jnp.exp(s_all)
        p_all = p_all * pl.reciprocal(jnp.sum(p_all, axis=-1, keepdims=True),
                                      approx=True)

        # per-head p @ v, then lane-concat heads into one (BT, E) tile
        o_parts = []
        for hh in range(H):
            lo = hh * D
            ph = p_all[hh * BT:(hh + 1) * BT, :].astype(bf16)
            vh = v[:, lo:lo + D].astype(bf16)
            o_parts.append(jnp.dot(ph, vh, preferred_element_type=jnp.float32))
        o_all = jnp.concatenate(o_parts, axis=-1)                    # (BT, E)

        # single K=E output projection
        proj = jnp.dot(o_all.astype(bf16), wproj_ref[l],
                       preferred_element_type=jnp.float32)
        x = h + proj          # residual adds to the ln1 OUTPUT (as in reference)

        # --- ln2 + MLP ---
        h2 = _layernorm(x, g2_ref[l], b2_ref[l])
        ff = jnp.dot(h2.astype(bf16), w1_ref[l],
                     preferred_element_type=jnp.float32) + bias1_ref[l]
        ff = _gelu_exact(ff)
        ff = jnp.dot(ff.astype(bf16), w2_ref[l],
                     preferred_element_type=jnp.float32) + bias2_ref[l]
        x = h2 + ff

    # --- final LayerNorm + tied LM head (lane-dense V=128 store) ---
    hf = _layernorm(x, gf_ref[...], bf_ref[...])
    o_ref[...] = jnp.dot(hf.astype(bf16), wembt_ref[...],
                         preferred_element_type=jnp.float32).astype(o_ref.dtype)


# ------------------------------ wrappers (glue) --------------------------------
def rope_tables_bt():
    """Replicates RotaryEmbedding + apply_rotary's cos/sin[..., ::2] indexing exactly,
    as (B*T, E) full-width tables used by the kernel (tiled across heads and batch)."""
    inv_freq = 1.0 / (10000.0 ** (jnp.arange(0, D, 2, dtype=jnp.float32) / D))   # (D/2,)
    t = jnp.arange(CTX_LEN, dtype=jnp.float32)
    freqs = t[:, None] * inv_freq[None, :]                   # (ctx, D/2)
    emb = jnp.concatenate([freqs, freqs], axis=-1)           # (ctx, D)
    cos_h = jnp.cos(emb)[:T, ::2]                            # == cos[..., ::2] in reference
    sin_h = jnp.sin(emb)[:T, ::2]
    cos_d = jnp.repeat(cos_h, 2, axis=-1)                    # (T, D): c0,c0,c1,c1,...
    sin_d = jnp.repeat(sin_h, 2, axis=-1)
    sign = jnp.tile(jnp.array([-1.0, 1.0], jnp.float32), D // 2)
    cos_e = jnp.tile(cos_d, (1, H))                          # (T, E)
    sin_e = jnp.tile(sin_d * sign, (1, H))                   # (T, E)
    return jnp.tile(cos_e, (B, 1)), jnp.tile(sin_e, (B, 1))  # (B*T, E)


def pair_swap_matrix():
    """(E, E) permutation matrix swapping adjacent even/odd lanes: (x @ P)[2i]=x[2i+1]."""
    idx = jnp.arange(E)
    return (idx[:, None] == (idx ^ 1)[None, :]).astype(jnp.float32)


def attn_bias_stacked():
    """Block-diagonal causal additive bias, tiled per head: (H*BT, BT) of 0 / -1e30."""
    row = jnp.arange(BT)
    col = jnp.arange(BT)
    allowed = ((row[:, None] // T) == (col[None, :] // T)) & (col[None, :] <= row[:, None])
    bias = jnp.where(allowed, 0.0, -1e30).astype(jnp.float32)        # (BT, BT)
    return jnp.tile(bias, (H, 1))                                     # (H*BT, BT)


def init_params(key):
    keys = jax.random.split(key, 1 + N_LAYERS)

    def nrm(k, shape, scale=0.02):
        return (scale * jax.random.normal(k, shape)).astype(jnp.float32)

    tok_emb = nrm(keys[0], (V, E))                            # nn.Embedding(vocab, n_embed)
    layers = []
    for li in range(N_LAYERS):
        lk = jax.random.split(keys[1 + li], 8)
        layers.append(dict(
            g1=jnp.ones((1, E), jnp.float32), b1=jnp.zeros((1, E), jnp.float32),
            wq=nrm(lk[0], (E, E)), wk=nrm(lk[1], (E, E)), wv=nrm(lk[2], (E, E)),
            wproj=nrm(lk[3], (E, E)),                         # proj Linear (no bias), transposed
            g2=jnp.ones((1, E), jnp.float32), b2=jnp.zeros((1, E), jnp.float32),
            w1=nrm(lk[4], (E, INNER)), bias1=nrm(lk[5], (1, INNER)),   # fc1
            w2=nrm(lk[6], (INNER, E)), bias2=nrm(lk[7], (1, E)),       # fc2
        ))
    gf = jnp.ones((1, E), jnp.float32)
    bf = jnp.zeros((1, E), jnp.float32)
    return tok_emb, layers, gf, bf


def minimal_gpt_forward(input_ids, tok_emb, layers, gf, bf):
    cos_bt, sin_bt = rope_tables_bt()
    wswap = pair_swap_matrix().astype(jnp.bfloat16)
    abias = attn_bias_stacked()
    wembt = tok_emb.T.astype(jnp.bfloat16)                    # tied head: x @ W_emb.T

    x = jnp.take(tok_emb, input_ids.reshape(-1), axis=0)      # (B*T, E) embedding lookup

    def stk(name, dtype=None):
        a = jnp.stack([p[name] for p in layers], axis=0)
        return a.astype(dtype) if dtype is not None else a

    # MXU-operand weights in bf16; LN scales/shifts and biases stay f32 (VPU math).
    stacked = [stk('g1'), stk('b1'),
               stk('wq', jnp.bfloat16), stk('wk', jnp.bfloat16),
               stk('wv', jnp.bfloat16), stk('wproj', jnp.bfloat16),
               stk('g2'), stk('b2'),
               stk('w1', jnp.bfloat16), stk('bias1'),
               stk('w2', jnp.bfloat16), stk('bias2')]
    invariants = [cos_bt, sin_bt, wswap, abias, gf, bf, wembt]

    n_inputs = 1 + len(stacked) + len(invariants)
    vmem_spec = pl.BlockSpec(memory_space=pltpu.MemorySpace.VMEM)  # whole array, VMEM-resident

    logits_flat = pl.pallas_call(
        gpt_kernel,
        out_shape=jax.ShapeDtypeStruct((BT, V), jnp.float32),
        in_specs=[vmem_spec] * n_inputs,
        out_specs=vmem_spec,
    )(x, *stacked, *invariants)
    return logits_flat.reshape(B, T, V)


# --------------------------- pure-JAX reference check ---------------------------
def reference_forward(input_ids, tok_emb, layers, gf, bf):
    cos_bt, sin_bt = rope_tables_bt()
    cos_e, sin_e = cos_bt[:T], sin_bt[:T]                     # (T, E)
    wswap = pair_swap_matrix()
    x = jnp.take(tok_emb, input_ids, axis=0)                  # (B, T, E)
    allowed = jnp.arange(T)[None, :] <= jnp.arange(T)[:, None]
    for p in layers:
        h = _layernorm(x, p['g1'], p['b1'])
        q, k, v = h @ p['wq'], h @ p['wk'], h @ p['wv']
        q = q * cos_e + (q @ wswap) * sin_e
        k = k * cos_e + (k @ wswap) * sin_e
        qh = q.reshape(B, T, H, D).transpose(0, 2, 1, 3)
        kh = k.reshape(B, T, H, D).transpose(0, 2, 1, 3)
        vh = v.reshape(B, T, H, D).transpose(0, 2, 1, 3)
        s = jnp.einsum('bhqd,bhkd->bhqk', qh, kh) / math.sqrt(D)
        s = jnp.where(allowed, s, -1e30)
        pr = jax.nn.softmax(s, axis=-1)
        o = jnp.einsum('bhqk,bhkd->bhqd', pr, vh).transpose(0, 2, 1, 3).reshape(B, T, E)
        x = h + o @ p['wproj']
        h2 = _layernorm(x, p['g2'], p['b2'])
        ff = _gelu_exact(h2 @ p['w1'] + p['bias1']) @ p['w2'] + p['bias2']
        x = h2 + ff
    return _layernorm(x, gf, bf) @ tok_emb.T


if __name__ == "__main__":
    key = jax.random.PRNGKey(0)
    pkey, dkey = jax.random.split(key)
    tok_emb, layers, gf, bf = init_params(pkey)
    input_ids = jax.random.randint(dkey, (B, T), 0, V, dtype=jnp.int32)

    logits = minimal_gpt_forward(input_ids, tok_emb, layers, gf, bf)
    logits = jax.block_until_ready(logits)
    assert logits.shape == (B, T, V) and logits.dtype == jnp.float32

    ref = reference_forward(input_ids, tok_emb, layers, gf, bf)
    err = float(jnp.max(jnp.abs(logits - ref)))
    assert err < 5e-2, f"mismatch vs JAX reference: {err}"
    print("KERNEL_OK")
</pallas_src>

<mosaic_0001>
module attributes {stable_mosaic.version = 11 : i64} {
  func.func @gpt_kernel(%arg0: memref<16x32xf32, #tpu.memory_space<vmem>>, %arg1: memref<2x1x32xf32, #tpu.memory_space<vmem>>, %arg2: memref<2x1x32xf32, #tpu.memory_space<vmem>>, %arg3: memref<2x32x32xbf16, #tpu.memory_space<vmem>>, %arg4: memref<2x32x32xbf16, #tpu.memory_space<vmem>>, %arg5: memref<2x32x32xbf16, #tpu.memory_space<vmem>>, %arg6: memref<2x32x32xbf16, #tpu.memory_space<vmem>>, %arg7: memref<2x1x32xf32, #tpu.memory_space<vmem>>, %arg8: memref<2x1x32xf32, #tpu.memory_space<vmem>>, %arg9: memref<2x32x128xbf16, #tpu.memory_space<vmem>>, %arg10: memref<2x1x128xf32, #tpu.memory_space<vmem>>, %arg11: memref<2x128x32xbf16, #tpu.memory_space<vmem>>, %arg12: memref<2x1x32xf32, #tpu.memory_space<vmem>>, %arg13: memref<16x32xf32, #tpu.memory_space<vmem>>, %arg14: memref<16x32xf32, #tpu.memory_space<vmem>>, %arg15: memref<32x32xbf16, #tpu.memory_space<vmem>>, %arg16: memref<64x16xf32, #tpu.memory_space<vmem>>, %arg17: memref<1x32xf32, #tpu.memory_space<vmem>>, %arg18: memref<1x32xf32, #tpu.memory_space<vmem>>, %arg19: memref<32x128xbf16, #tpu.memory_space<vmem>>, %arg20: memref<16x128xf32, #tpu.memory_space<vmem>>) attributes {dimension_semantics = [], scalar_prefetch = 0 : i64, scratch_operands = 0 : i64, tpu.core_type = #tpu.core_type<tc>} {
    %c0 = arith.constant 0 : index
    %c0_0 = arith.constant 0 : index
    %0 = vector.load %arg0[%c0, %c0_0] : memref<16x32xf32, #tpu.memory_space<vmem>>, vector<16x32xf32>
    %c0_1 = arith.constant 0 : index
    %c0_2 = arith.constant 0 : index
    %1 = vector.load %arg13[%c0_1, %c0_2] : memref<16x32xf32, #tpu.memory_space<vmem>>, vector<16x32xf32>
    %c0_3 = arith.constant 0 : index
    %c0_4 = arith.constant 0 : index
    %2 = vector.load %arg14[%c0_3, %c0_4] : memref<16x32xf32, #tpu.memory_space<vmem>>, vector<16x32xf32>
    %c0_5 = arith.constant 0 : index
    %c0_6 = arith.constant 0 : index
    %3 = vector.load %arg15[%c0_5, %c0_6] : memref<32x32xbf16, #tpu.memory_space<vmem>>, vector<32x32xbf16>
    %c0_7 = arith.constant 0 : index
    %c0_8 = arith.constant 0 : index
    %4 = vector.load %arg16[%c0_7, %c0_8] : memref<64x16xf32, #tpu.memory_space<vmem>>, vector<64x16xf32>
    %c0_9 = arith.constant 0 : index
    %c0_10 = arith.constant 0 : index
    %c0_11 = arith.constant 0 : index
    %5 = vector.load %arg1[%c0_9, %c0_10, %c0_11] : memref<2x1x32xf32, #tpu.memory_space<vmem>>, vector<1x1x32xf32>
    %6 = vector.shape_cast %5 : vector<1x1x32xf32> to vector<1x32xf32>
    %c0_12 = arith.constant 0 : index
    %c0_13 = arith.constant 0 : index
    %c0_14 = arith.constant 0 : index
    %7 = vector.load %arg2[%c0_12, %c0_13, %c0_14] : memref<2x1x32xf32, #tpu.memory_space<vmem>>, vector<1x1x32xf32>
    %8 = vector.shape_cast %7 : vector<1x1x32xf32> to vector<1x32xf32>
    %cst = arith.constant dense<0.000000e+00> : vector<16xf32>
    %9 = vector.multi_reduction <add>, %0, %cst [1] : vector<16x32xf32> to vector<16xf32>
    %10 = vector.shape_cast %9 : vector<16xf32> to vector<16x1xf32>
    %11 = arith.mulf %0, %0 : vector<16x32xf32>
    %cst_15 = arith.constant dense<0.000000e+00> : vector<16xf32>
    %12 = vector.multi_reduction <add>, %11, %cst_15 [1] : vector<16x32xf32> to vector<16xf32>
    %13 = vector.shape_cast %12 : vector<16xf32> to vector<16x1xf32>
    %cst_16 = arith.constant 3.125000e-02 : f32
    %14 = vector.broadcast %cst_16 : f32 to vector<16x1xf32>
    %15 = arith.mulf %10, %14 : vector<16x1xf32>
    %cst_17 = arith.constant 3.125000e-02 : f32
    %16 = vector.broadcast %cst_17 : f32 to vector<16x1xf32>
    %17 = arith.mulf %13, %16 : vector<16x1xf32>
    %18 = arith.mulf %15, %15 : vector<16x1xf32>
    %19 = arith.subf %17, %18 : vector<16x1xf32>
    %20 = vector.broadcast %15 : vector<16x1xf32> to vector<16x32xf32>
    %21 = arith.subf %0, %20 : vector<16x32xf32>
    %cst_18 = arith.constant 9.99999974E-6 : f32
    %22 = vector.broadcast %cst_18 : f32 to vector<16x1xf32>
    %23 = arith.addf %19, %22 : vector<16x1xf32>
    %24 = math.rsqrt %23 : vector<16x1xf32>
    %25 = vector.broadcast %24 : vector<16x1xf32> to vector<16x32xf32>
    %26 = arith.mulf %21, %25 : vector<16x32xf32>
    %27 = vector.broadcast %6 : vector<1x32xf32> to vector<16x32xf32>
    %28 = arith.mulf %26, %27 : vector<16x32xf32>
    %29 = vector.broadcast %8 : vector<1x32xf32> to vector<16x32xf32>
    %30 = arith.addf %28, %29 : vector<16x32xf32>
    %31 = arith.truncf %30 : vector<16x32xf32> to vector<16x32xbf16>
    %c0_19 = arith.constant 0 : index
    %c0_20 = arith.constant 0 : index
    %c0_21 = arith.constant 0 : index
    %32 = vector.load %arg3[%c0_19, %c0_20, %c0_21] : memref<2x32x32xbf16, #tpu.memory_space<vmem>>, vector<1x32x32xbf16>
    %33 = vector.shape_cast %32 : vector<1x32x32xbf16> to vector<32x32xbf16>
    %cst_22 = arith.constant dense<0.000000e+00> : vector<16x32xf32>
    %34 = tpu.matmul %31, %33, %cst_22 {dimension_numbers = #tpu.dot_dimension_numbers<[1], [0], [0], [1], [0, 0, 1, 1], [], []>} : vector<16x32xbf16>, vector<32x32xbf16>, vector<16x32xf32> -> vector<16x32xf32>
    %c0_23 = arith.constant 0 : index
    %c0_24 = arith.constant 0 : index
    %c0_25 = arith.constant 0 : index
    %35 = vector.load %arg4[%c0_23, %c0_24, %c0_25] : memref<2x32x32xbf16, #tpu.memory_space<vmem>>, vector<1x32x32xbf16>
    %36 = vector.shape_cast %35 : vector<1x32x32xbf16> to vector<32x32xbf16>
    %cst_26 = arith.constant dense<0.000000e+00> : vector<16x32xf32>
    %37 = tpu.matmul %31, %36, %cst_26 {dimension_numbers = #tpu.dot_dimension_numbers<[1], [0], [0], [1], [0, 0, 1, 1], [], []>} : vector<16x32xbf16>, vector<32x32xbf16>, vector<16x32xf32> -> vector<16x32xf32>
    %c0_27 = arith.constant 0 : index
    %c0_28 = arith.constant 0 : index
    %c0_29 = arith.constant 0 : index
    %38 = vector.load %arg5[%c0_27, %c0_28, %c0_29] : memref<2x32x32xbf16, #tpu.memory_space<vmem>>, vector<1x32x32xbf16>
    %39 = vector.shape_cast %38 : vector<1x32x32xbf16> to vector<32x32xbf16>
    %cst_30 = arith.constant dense<0.000000e+00> : vector<16x32xf32>
    %40 = tpu.matmul %31, %39, %cst_30 {dimension_numbers = #tpu.dot_dimension_numbers<[1], [0], [0], [1], [0, 0, 1, 1], [], []>} : vector<16x32xbf16>, vector<32x32xbf16>, vector<16x32xf32> -> vector<16x32xf32>
    %41 = arith.mulf %34, %1 : vector<16x32xf32>
    %42 = arith.truncf %34 : vector<16x32xf32> to vector<16x32xbf16>
    %cst_31 = arith.constant dense<0.000000e+00> : vector<16x32xf32>
    %43 = tpu.matmul %42, %3, %cst_31 {dimension_numbers = #tpu.dot_dimension_numbers<[1], [0], [0], [1], [0, 0, 1, 1], [], []>} : vector<16x32xbf16>, vector<32x32xbf16>, vector<16x32xf32> -> vector<16x32xf32>
    %44 = arith.mulf %43, %2 : vector<16x32xf32>
    %45 = arith.addf %41, %44 : vector<16x32xf32>
    %46 = arith.mulf %37, %1 : vector<16x32xf32>
    %47 = arith.truncf %37 : vector<16x32xf32> to vector<16x32xbf16>
    %cst_32 = arith.constant dense<0.000000e+00> : vector<16x32xf32>
    %48 = tpu.matmul %47, %3, %cst_32 {dimension_numbers = #tpu.dot_dimension_numbers<[1], [0], [0], [1], [0, 0, 1, 1], [], []>} : vector<16x32xbf16>, vector<32x32xbf16>, vector<16x32xf32> -> vector<16x32xf32>
    %49 = arith.mulf %48, %2 : vector<16x32xf32>
    %50 = arith.addf %46, %49 : vector<16x32xf32>
    %51 = vector.extract_strided_slice %45 {offsets = [0, 0], sizes = [16, 8], strides = [1, 1]} : vector<16x32xf32> to vector<16x8xf32>
    %52 = arith.truncf %51 : vector<16x8xf32> to vector<16x8xbf16>
    %53 = vector.extract_strided_slice %50 {offsets = [0, 0], sizes = [16, 8], strides = [1, 1]} : vector<16x32xf32> to vector<16x8xf32>
    %54 = arith.truncf %53 : vector<16x8xf32> to vector<16x8xbf16>
    %cst_33 = arith.constant dense<0.000000e+00> : vector<16x16xf32>
    %55 = tpu.matmul %52, %54, %cst_33 {dimension_numbers = #tpu.dot_dimension_numbers<[1], [1], [0], [0], [0, 0, 1, 0], [], []>} : vector<16x8xbf16>, vector<16x8xbf16>, vector<16x16xf32> -> vector<16x16xf32>
    %56 = vector.extract_strided_slice %45 {offsets = [0, 8], sizes = [16, 8], strides = [1, 1]} : vector<16x32xf32> to vector<16x8xf32>
    %57 = arith.truncf %56 : vector<16x8xf32> to vector<16x8xbf16>
    %58 = vector.extract_strided_slice %50 {offsets = [0, 8], sizes = [16, 8], strides = [1, 1]} : vector<16x32xf32> to vector<16x8xf32>
    %59 = arith.truncf %58 : vector<16x8xf32> to vector<16x8xbf16>
    %cst_34 = arith.constant dense<0.000000e+00> : vector<16x16xf32>
    %60 = tpu.matmul %57, %59, %cst_34 {dimension_numbers = #tpu.dot_dimension_numbers<[1], [1], [0], [0], [0, 0, 1, 0], [], []>} : vector<16x8xbf16>, vector<16x8xbf16>, vector<16x16xf32> -> vector<16x16xf32>
    %61 = vector.extract_strided_slice %45 {offsets = [0, 16], sizes = [16, 8], strides = [1, 1]} : vector<16x32xf32> to vector<16x8xf32>
    %62 = arith.truncf %61 : vector<16x8xf32> to vector<16x8xbf16>
    %63 = vector.extract_strided_slice %50 {offsets = [0, 16], sizes = [16, 8], strides = [1, 1]} : vector<16x32xf32> to vector<16x8xf32>
    %64 = arith.truncf %63 : vector<16x8xf32> to vector<16x8xbf16>
    %cst_35 = arith.constant dense<0.000000e+00> : vector<16x16xf32>
    %65 = tpu.matmul %62, %64, %cst_35 {dimension_numbers = #tpu.dot_dimension_numbers<[1], [1], [0], [0], [0, 0, 1, 0], [], []>} : vector<16x8xbf16>, vector<16x8xbf16>, vector<16x16xf32> -> vector<16x16xf32>
    %66 = vector.extract_strided_slice %45 {offsets = [0, 24], sizes = [16, 8], strides = [1, 1]} : vector<16x32xf32> to vector<16x8xf32>
    %67 = arith.truncf %66 : vector<16x8xf32> to vector<16x8xbf16>
    %68 = vector.extract_strided_slice %50 {offsets = [0, 24], sizes = [16, 8], strides = [1, 1]} : vector<16x32xf32> to vector<16x8xf32>
    %69 = arith.truncf %68 : vector<16x8xf32> to vector<16x8xbf16>
    %cst_36 = arith.constant dense<0.000000e+00> : vector<16x16xf32>
    %70 = tpu.matmul %67, %69, %cst_36 {dimension_numbers = #tpu.dot_dimension_numbers<[1], [1], [0], [0], [0, 0, 1, 0], [], []>} : vector<16x8xbf16>, vector<16x8xbf16>, vector<16x16xf32> -> vector<16x16xf32>
    %71 = tpu.concatenate %55, %60, %65, %70 in 0 : vector<16x16xf32>, vector<16x16xf32>, vector<16x16xf32>, vector<16x16xf32> -> vector<64x16xf32>
    %cst_37 = arith.constant 0.353553385 : f32
    %72 = vector.broadcast %cst_37 : f32 to vector<64x16xf32>
    %73 = arith.mulf %71, %72 : vector<64x16xf32>
    %74 = arith.addf %73, %4 : vector<64x16xf32>
    %cst_38 = arith.constant dense<0xFF800000> : vector<64xf32>
    %75 = vector.multi_reduction <maximumf>, %74, %cst_38 [1] : vector<64x16xf32> to vector<64xf32>
    %76 = vector.shape_cast %75 : vector<64xf32> to vector<64x1xf32>
    %77 = vector.broadcast %76 : vector<64x1xf32> to vector<64x16xf32>
    %78 = arith.subf %74, %77 : vector<64x16xf32>
    %79 = math.exp %78 : vector<64x16xf32>
    %cst_39 = arith.constant dense<0.000000e+00> : vector<64xf32>
    %80 = vector.multi_reduction <add>, %79, %cst_39 [1] : vector<64x16xf32> to vector<64xf32>
    %81 = vector.shape_cast %80 : vector<64xf32> to vector<64x1xf32>
    %82 = tpu.reciprocal %81 {approx = true} : vector<64x1xf32> -> vector<64x1xf32>
    %83 = vector.broadcast %82 : vector<64x1xf32> to vector<64x16xf32>
    %84 = arith.mulf %79, %83 : vector<64x16xf32>
    %85 = vector.extract_strided_slice %84 {offsets = [0, 0], sizes = [16, 16], strides = [1, 1]} : vector<64x16xf32> to vector<16x16xf32>
    %86 = arith.truncf %85 : vector<16x16xf32> to vector<16x16xbf16>
    %87 = vector.extract_strided_slice %40 {offsets = [0, 0], sizes = [16, 8], strides = [1, 1]} : vector<16x32xf32> to vector<16x8xf32>
    %88 = arith.truncf %87 : vector<16x8xf32> to vector<16x8xbf16>
    %cst_40 = arith.constant dense<0.000000e+00> : vector<16x8xf32>
    %89 = tpu.matmul %86, %88, %cst_40 {dimension_numbers = #tpu.dot_dimension_numbers<[1], [0], [0], [1], [0, 0, 1, 1], [], []>} : vector<16x16xbf16>, vector<16x8xbf16>, vector<16x8xf32> -> vector<16x8xf32>
    %90 = vector.extract_strided_slice %84 {offsets = [16, 0], sizes = [16, 16], strides = [1, 1]} : vector<64x16xf32> to vector<16x16xf32>
    %91 = arith.truncf %90 : vector<16x16xf32> to vector<16x16xbf16>
    %92 = vector.extract_strided_slice %40 {offsets = [0, 8], sizes = [16, 8], strides = [1, 1]} : vector<16x32xf32> to vector<16x8xf32>
    %93 = arith.truncf %92 : vector<16x8xf32> to vector<16x8xbf16>
    %cst_41 = arith.constant dense<0.000000e+00> : vector<16x8xf32>
    %94 = tpu.matmul %91, %93, %cst_41 {dimension_numbers = #tpu.dot_dimension_numbers<[1], [0], [0], [1], [0, 0, 1, 1], [], []>} : vector<16x16xbf16>, vector<16x8xbf16>, vector<16x8xf32> -> vector<16x8xf32>
    %95 = vector.extract_strided_slice %84 {offsets = [32, 0], sizes = [16, 16], strides = [1, 1]} : vector<64x16xf32> to vector<16x16xf32>
    %96 = arith.truncf %95 : vector<16x16xf32> to vector<16x16xbf16>
    %97 = vector.extract_strided_slice %40 {offsets = [0, 16], sizes = [16, 8], strides = [1, 1]} : vector<16x32xf32> to vector<16x8xf32>
    %98 = arith.truncf %97 : vector<16x8xf32> to vector<16x8xbf16>
    %cst_42 = arith.constant dense<0.000000e+00> : vector<16x8xf32>
    %99 = tpu.matmul %96, %98, %cst_42 {dimension_numbers = #tpu.dot_dimension_numbers<[1], [0], [0], [1], [0, 0, 1, 1], [], []>} : vector<16x16xbf16>, vector<16x8xbf16>, vector<16x8xf32> -> vector<16x8xf32>
    %100 = vector.extract_strided_slice %84 {offsets = [48, 0], sizes = [16, 16], strides = [1, 1]} : vector<64x16xf32> to vector<16x16xf32>
    %101 = arith.truncf %100 : vector<16x16xf32> to vector<16x16xbf16>
    %102 = vector.extract_strided_slice %40 {offsets = [0, 24], sizes = [16, 8], strides = [1, 1]} : vector<16x32xf32> to vector<16x8xf32>
    %103 = arith.truncf %102 : vector<16x8xf32> to vector<16x8xbf16>
    %cst_43 = arith.constant dense<0.000000e+00> : vector<16x8xf32>
    %104 = tpu.matmul %101, %103, %cst_43 {dimension_numbers = #tpu.dot_dimension_numbers<[1], [0], [0], [1], [0, 0, 1, 1], [], []>} : vector<16x16xbf16>, vector<16x8xbf16>, vector<16x8xf32> -> vector<16x8xf32>
    %105 = tpu.concatenate %89, %94, %99, %104 in 1 : vector<16x8xf32>, vector<16x8xf32>, vector<16x8xf32>, vector<16x8xf32> -> vector<16x32xf32>
    %106 = arith.truncf %105 : vector<16x32xf32> to vector<16x32xbf16>
    %c0_44 = arith.constant 0 : index
    %c0_45 = arith.constant 0 : index
    %c0_46 = arith.constant 0 : index
    %107 = vector.load %arg6[%c0_44, %c0_45, %c0_46] : memref<2x32x32xbf16, #tpu.memory_space<vmem>>, vector<1x32x32xbf16>
    %108 = vector.shape_cast %107 : vector<1x32x32xbf16> to vector<32x32xbf16>
    %cst_47 = arith.constant dense<0.000000e+00> : vector<16x32xf32>
    %109 = tpu.matmul %106, %108, %cst_47 {dimension_numbers = #tpu.dot_dimension_numbers<[1], [0], [0], [1], [0, 0, 1, 1], [], []>} : vector<16x32xbf16>, vector<32x32xbf16>, vector<16x32xf32> -> vector<16x32xf32>
    %110 = arith.addf %30, %109 : vector<16x32xf32>
    %c0_48 = arith.constant 0 : index
    %c0_49 = arith.constant 0 : index
    %c0_50 = arith.constant 0 : index
    %111 = vector.load %arg7[%c0_48, %c0_49, %c0_50] : memref<2x1x32xf32, #tpu.memory_space<vmem>>, vector<1x1x32xf32>
    %112 = vector.shape_cast %111 : vector<1x1x32xf32> to vector<1x32xf32>
    %c0_51 = arith.constant 0 : index
    %c0_52 = arith.constant 0 : index
    %c0_53 = arith.constant 0 : index
    %113 = vector.load %arg8[%c0_51, %c0_52, %c0_53] : memref<2x1x32xf32, #tpu.memory_space<vmem>>, vector<1x1x32xf32>
    %114 = vector.shape_cast %113 : vector<1x1x32xf32> to vector<1x32xf32>
    %cst_54 = arith.constant dense<0.000000e+00> : vector<16xf32>
    %115 = vector.multi_reduction <add>, %110, %cst_54 [1] : vector<16x32xf32> to vector<16xf32>
    %116 = vector.shape_cast %115 : vector<16xf32> to vector<16x1xf32>
    %117 = arith.mulf %110, %110 : vector<16x32xf32>
    %cst_55 = arith.constant dense<0.000000e+00> : vector<16xf32>
    %118 = vector.multi_reduction <add>, %117, %cst_55 [1] : vector<16x32xf32> to vector<16xf32>
    %119 = vector.shape_cast %118 : vector<16xf32> to vector<16x1xf32>
    %cst_56 = arith.constant 3.125000e-02 : f32
    %120 = vector.broadcast %cst_56 : f32 to vector<16x1xf32>
    %121 = arith.mulf %116, %120 : vector<16x1xf32>
    %cst_57 = arith.constant 3.125000e-02 : f32
    %122 = vector.broadcast %cst_57 : f32 to vector<16x1xf32>
    %123 = arith.mulf %119, %122 : vector<16x1xf32>
    %124 = arith.mulf %121, %121 : vector<16x1xf32>
    %125 = arith.subf %123, %124 : vector<16x1xf32>
    %126 = vector.broadcast %121 : vector<16x1xf32> to vector<16x32xf32>
    %127 = arith.subf %110, %126 : vector<16x32xf32>
    %cst_58 = arith.constant 9.99999974E-6 : f32
    %128 = vector.broadcast %cst_58 : f32 to vector<16x1xf32>
    %129 = arith.addf %125, %128 : vector<16x1xf32>
    %130 = math.rsqrt %129 : vector<16x1xf32>
    %131 = vector.broadcast %130 : vector<16x1xf32> to vector<16x32xf32>
    %132 = arith.mulf %127, %131 : vector<16x32xf32>
    %133 = vector.broadcast %112 : vector<1x32xf32> to vector<16x32xf32>
    %134 = arith.mulf %132, %133 : vector<16x32xf32>
    %135 = vector.broadcast %114 : vector<1x32xf32> to vector<16x32xf32>
    %136 = arith.addf %134, %135 : vector<16x32xf32>
    %137 = arith.truncf %136 : vector<16x32xf32> to vector<16x32xbf16>
    %c0_59 = arith.constant 0 : index
    %c0_60 = arith.constant 0 : index
    %c0_61 = arith.constant 0 : index
    %138 = vector.load %arg9[%c0_59, %c0_60, %c0_61] : memref<2x32x128xbf16, #tpu.memory_space<vmem>>, vector<1x32x128xbf16>
    %139 = vector.shape_cast %138 : vector<1x32x128xbf16> to vector<32x128xbf16>
    %cst_62 = arith.constant dense<0.000000e+00> : vector<16x128xf32>
    %140 = tpu.matmul %137, %139, %cst_62 {dimension_numbers = #tpu.dot_dimension_numbers<[1], [0], [0], [1], [0, 0, 1, 1], [], []>} : vector<16x32xbf16>, vector<32x128xbf16>, vector<16x128xf32> -> vector<16x128xf32>
    %c0_63 = arith.constant 0 : index
    %c0_64 = arith.constant 0 : index
    %c0_65 = arith.constant 0 : index
    %141 = vector.load %arg10[%c0_63, %c0_64, %c0_65] : memref<2x1x128xf32, #tpu.memory_space<vmem>>, vector<1x1x128xf32>
    %142 = vector.shape_cast %141 : vector<1x1x128xf32> to vector<1x128xf32>
    %143 = vector.broadcast %142 : vector<1x128xf32> to vector<16x128xf32>
    %144 = arith.addf %140, %143 : vector<16x128xf32>
    %cst_66 = arith.constant 5.000000e-01 : f32
    %145 = vector.broadcast %cst_66 : f32 to vector<16x128xf32>
    %146 = arith.mulf %145, %144 : vector<16x128xf32>
    %cst_67 = arith.constant 0.707106769 : f32
    %147 = vector.broadcast %cst_67 : f32 to vector<16x128xf32>
    %148 = arith.mulf %144, %147 : vector<16x128xf32>
    %149 = math.erf %148 : vector<16x128xf32>
    %cst_68 = arith.constant 1.000000e+00 : f32
    %150 = vector.broadcast %cst_68 : f32 to vector<16x128xf32>
    %151 = arith.addf %150, %149 : vector<16x128xf32>
    %152 = arith.mulf %146, %151 : vector<16x128xf32>
    %153 = arith.truncf %152 : vector<16x128xf32> to vector<16x128xbf16>
    %c0_69 = arith.constant 0 : index
    %c0_70 = arith.constant 0 : index
    %c0_71 = arith.constant 0 : index
    %154 = vector.load %arg11[%c0_69, %c0_70, %c0_71] : memref<2x128x32xbf16, #tpu.memory_space<vmem>>, vector<1x128x32xbf16>
    %155 = vector.shape_cast %154 : vector<1x128x32xbf16> to vector<128x32xbf16>
    %cst_72 = arith.constant dense<0.000000e+00> : vector<16x32xf32>
    %156 = tpu.matmul %153, %155, %cst_72 {dimension_numbers = #tpu.dot_dimension_numbers<[1], [0], [0], [1], [0, 0, 1, 1], [], []>} : vector<16x128xbf16>, vector<128x32xbf16>, vector<16x32xf32> -> vector<16x32xf32>
    %c0_73 = arith.constant 0 : index
    %c0_74 = arith.constant 0 : index
    %c0_75 = arith.constant 0 : index
    %157 = vector.load %arg12[%c0_73, %c0_74, %c0_75] : memref<2x1x32xf32, #tpu.memory_space<vmem>>, vector<1x1x32xf32>
    %158 = vector.shape_cast %157 : vector<1x1x32xf32> to vector<1x32xf32>
    %159 = vector.broadcast %158 : vector<1x32xf32> to vector<16x32xf32>
    %160 = arith.addf %156, %159 : vector<16x32xf32>
    %161 = arith.addf %136, %160 : vector<16x32xf32>
    %c1 = arith.constant 1 : index
    %c0_76 = arith.constant 0 : index
    %c0_77 = arith.constant 0 : index
    %162 = vector.load %arg1[%c1, %c0_76, %c0_77] : memref<2x1x32xf32, #tpu.memory_space<vmem>>, vector<1x1x32xf32>
    %163 = vector.shape_cast %162 : vector<1x1x32xf32> to vector<1x32xf32>
    %c1_78 = arith.constant 1 : index
    %c0_79 = arith.constant 0 : index
    %c0_80 = arith.constant 0 : index
    %164 = vector.load %arg2[%c1_78, %c0_79, %c0_80] : memref<2x1x32xf32, #tpu.memory_space<vmem>>, vector<1x1x32xf32>
    %165 = vector.shape_cast %164 : vector<1x1x32xf32> to vector<1x32xf32>
    %cst_81 = arith.constant dense<0.000000e+00> : vector<16xf32>
    %166 = vector.multi_reduction <add>, %161, %cst_81 [1] : vector<16x32xf32> to vector<16xf32>
    %167 = vector.shape_cast %166 : vector<16xf32> to vector<16x1xf32>
    %168 = arith.mulf %161, %161 : vector<16x32xf32>
    %cst_82 = arith.constant dense<0.000000e+00> : vector<16xf32>
    %169 = vector.multi_reduction <add>, %168, %cst_82 [1] : vector<16x32xf32> to vector<16xf32>
    %170 = vector.shape_cast %169 : vector<16xf32> to vector<16x1xf32>
    %cst_83 = arith.constant 3.125000e-02 : f32
    %171 = vector.broadcast %cst_83 : f32 to vector<16x1xf32>
    %172 = arith.mulf %167, %171 : vector<16x1xf32>
    %cst_84 = arith.constant 3.125000e-02 : f32
    %173 = vector.broadcast %cst_84 : f32 to vector<16x1xf32>
    %174 = arith.mulf %170, %173 : vector<16x1xf32>
    %175 = arith.mulf %172, %172 : vector<16x1xf32>
    %176 = arith.subf %174, %175 : vector<16x1xf32>
    %177 = vector.broadcast %172 : vector<16x1xf32> to vector<16x32xf32>
    %178 = arith.subf %161, %177 : vector<16x32xf32>
    %cst_85 = arith.constant 9.99999974E-6 : f32
    %179 = vector.broadcast %cst_85 : f32 to vector<16x1xf32>
    %180 = arith.addf %176, %179 : vector<16x1xf32>
    %181 = math.rsqrt %180 : vector<16x1xf32>
    %182 = vector.broadcast %181 : vector<16x1xf32> to vector<16x32xf32>
    %183 = arith.mulf %178, %182 : vector<16x32xf32>
    %184 = vector.broadcast %163 : vector<1x32xf32> to vector<16x32xf32>
    %185 = arith.mulf %183, %184 : vector<16x32xf32>
    %186 = vector.broadcast %165 : vector<1x32xf32> to vector<16x32xf32>
    %187 = arith.addf %185, %186 : vector<16x32xf32>
    %188 = arith.truncf %187 : vector<16x32xf32> to vector<16x32xbf16>
    %c1_86 = arith.constant 1 : index
    %c0_87 = arith.constant 0 : index
    %c0_88 = arith.constant 0 : index
    %189 = vector.load %arg3[%c1_86, %c0_87, %c0_88] : memref<2x32x32xbf16, #tpu.memory_space<vmem>>, vector<1x32x32xbf16>
    %190 = vector.shape_cast %189 : vector<1x32x32xbf16> to vector<32x32xbf16>
    %cst_89 = arith.constant dense<0.000000e+00> : vector<16x32xf32>
    %191 = tpu.matmul %188, %190, %cst_89 {dimension_numbers = #tpu.dot_dimension_numbers<[1], [0], [0], [1], [0, 0, 1, 1], [], []>} : vector<16x32xbf16>, vector<32x32xbf16>, vector<16x32xf32> -> vector<16x32xf32>
    %c1_90 = arith.constant 1 : index
    %c0_91 = arith.constant 0 : index
    %c0_92 = arith.constant 0 : index
    %192 = vector.load %arg4[%c1_90, %c0_91, %c0_92] : memref<2x32x32xbf16, #tpu.memory_space<vmem>>, vector<1x32x32xbf16>
    %193 = vector.shape_cast %192 : vector<1x32x32xbf16> to vector<32x32xbf16>
    %cst_93 = arith.constant dense<0.000000e+00> : vector<16x32xf32>
    %194 = tpu.matmul %188, %193, %cst_93 {dimension_numbers = #tpu.dot_dimension_numbers<[1], [0], [0], [1], [0, 0, 1, 1], [], []>} : vector<16x32xbf16>, vector<32x32xbf16>, vector<16x32xf32> -> vector<16x32xf32>
    %c1_94 = arith.constant 1 : index
    %c0_95 = arith.constant 0 : index
    %c0_96 = arith.constant 0 : index
    %195 = vector.load %arg5[%c1_94, %c0_95, %c0_96] : memref<2x32x32xbf16, #tpu.memory_space<vmem>>, vector<1x32x32xbf16>
    %196 = vector.shape_cast %195 : vector<1x32x32xbf16> to vector<32x32xbf16>
    %cst_97 = arith.constant dense<0.000000e+00> : vector<16x32xf32>
    %197 = tpu.matmul %188, %196, %cst_97 {dimension_numbers = #tpu.dot_dimension_numbers<[1], [0], [0], [1], [0, 0, 1, 1], [], []>} : vector<16x32xbf16>, vector<32x32xbf16>, vector<16x32xf32> -> vector<16x32xf32>
    %198 = arith.mulf %191, %1 : vector<16x32xf32>
    %199 = arith.truncf %191 : vector<16x32xf32> to vector<16x32xbf16>
    %cst_98 = arith.constant dense<0.000000e+00> : vector<16x32xf32>
    %200 = tpu.matmul %199, %3, %cst_98 {dimension_numbers = #tpu.dot_dimension_numbers<[1], [0], [0], [1], [0, 0, 1, 1], [], []>} : vector<16x32xbf16>, vector<32x32xbf16>, vector<16x32xf32> -> vector<16x32xf32>
    %201 = arith.mulf %200, %2 : vector<16x32xf32>
    %202 = arith.addf %198, %201 : vector<16x32xf32>
    %203 = arith.mulf %194, %1 : vector<16x32xf32>
    %204 = arith.truncf %194 : vector<16x32xf32> to vector<16x32xbf16>
    %cst_99 = arith.constant dense<0.000000e+00> : vector<16x32xf32>
    %205 = tpu.matmul %204, %3, %cst_99 {dimension_numbers = #tpu.dot_dimension_numbers<[1], [0], [0], [1], [0, 0, 1, 1], [], []>} : vector<16x32xbf16>, vector<32x32xbf16>, vector<16x32xf32> -> vector<16x32xf32>
    %206 = arith.mulf %205, %2 : vector<16x32xf32>
    %207 = arith.addf %203, %206 : vector<16x32xf32>
    %208 = vector.extract_strided_slice %202 {offsets = [0, 0], sizes = [16, 8], strides = [1, 1]} : vector<16x32xf32> to vector<16x8xf32>
    %209 = arith.truncf %208 : vector<16x8xf32> to vector<16x8xbf16>
    %210 = vector.extract_strided_slice %207 {offsets = [0, 0], sizes = [16, 8], strides = [1, 1]} : vector<16x32xf32> to vector<16x8xf32>
    %211 = arith.truncf %210 : vector<16x8xf32> to vector<16x8xbf16>
    %cst_100 = arith.constant dense<0.000000e+00> : vector<16x16xf32>
    %212 = tpu.matmul %209, %211, %cst_100 {dimension_numbers = #tpu.dot_dimension_numbers<[1], [1], [0], [0], [0, 0, 1, 0], [], []>} : vector<16x8xbf16>, vector<16x8xbf16>, vector<16x16xf32> -> vector<16x16xf32>
    %213 = vector.extract_strided_slice %202 {offsets = [0, 8], sizes = [16, 8], strides = [1, 1]} : vector<16x32xf32> to vector<16x8xf32>
    %214 = arith.truncf %213 : vector<16x8xf32> to vector<16x8xbf16>
    %215 = vector.extract_strided_slice %207 {offsets = [0, 8], sizes = [16, 8], strides = [1, 1]} : vector<16x32xf32> to vector<16x8xf32>
    %216 = arith.truncf %215 : vector<16x8xf32> to vector<16x8xbf16>
    %cst_101 = arith.constant dense<0.000000e+00> : vector<16x16xf32>
    %217 = tpu.matmul %214, %216, %cst_101 {dimension_numbers = #tpu.dot_dimension_numbers<[1], [1], [0], [0], [0, 0, 1, 0], [], []>} : vector<16x8xbf16>, vector<16x8xbf16>, vector<16x16xf32> -> vector<16x16xf32>
    %218 = vector.extract_strided_slice %202 {offsets = [0, 16], sizes = [16, 8], strides = [1, 1]} : vector<16x32xf32> to vector<16x8xf32>
    %219 = arith.truncf %218 : vector<16x8xf32> to vector<16x8xbf16>
    %220 = vector.extract_strided_slice %207 {offsets = [0, 16], sizes = [16, 8], strides = [1, 1]} : vector<16x32xf32> to vector<16x8xf32>
    %221 = arith.truncf %220 : vector<16x8xf32> to vector<16x8xbf16>
    %cst_102 = arith.constant dense<0.000000e+00> : vector<16x16xf32>
    %222 = tpu.matmul %219, %221, %cst_102 {dimension_numbers = #tpu.dot_dimension_numbers<[1], [1], [0], [0], [0, 0, 1, 0], [], []>} : vector<16x8xbf16>, vector<16x8xbf16>, vector<16x16xf32> -> vector<16x16xf32>
    %223 = vector.extract_strided_slice %202 {offsets = [0, 24], sizes = [16, 8], strides = [1, 1]} : vector<16x32xf32> to vector<16x8xf32>
    %224 = arith.truncf %223 : vector<16x8xf32> to vector<16x8xbf16>
    %225 = vector.extract_strided_slice %207 {offsets = [0, 24], sizes = [16, 8], strides = [1, 1]} : vector<16x32xf32> to vector<16x8xf32>
    %226 = arith.truncf %225 : vector<16x8xf32> to vector<16x8xbf16>
    %cst_103 = arith.constant dense<0.000000e+00> : vector<16x16xf32>
    %227 = tpu.matmul %224, %226, %cst_103 {dimension_numbers = #tpu.dot_dimension_numbers<[1], [1], [0], [0], [0, 0, 1, 0], [], []>} : vector<16x8xbf16>, vector<16x8xbf16>, vector<16x16xf32> -> vector<16x16xf32>
    %228 = tpu.concatenate %212, %217, %222, %227 in 0 : vector<16x16xf32>, vector<16x16xf32>, vector<16x16xf32>, vector<16x16xf32> -> vector<64x16xf32>
    %cst_104 = arith.constant 0.353553385 : f32
    %229 = vector.broadcast %cst_104 : f32 to vector<64x16xf32>
    %230 = arith.mulf %228, %229 : vector<64x16xf32>
    %231 = arith.addf %230, %4 : vector<64x16xf32>
    %cst_105 = arith.constant dense<0xFF800000> : vector<64xf32>
    %232 = vector.multi_reduction <maximumf>, %231, %cst_105 [1] : vector<64x16xf32> to vector<64xf32>
    %233 = vector.shape_cast %232 : vector<64xf32> to vector<64x1xf32>
    %234 = vector.broadcast %233 : vector<64x1xf32> to vector<64x16xf32>
    %235 = arith.subf %231, %234 : vector<64x16xf32>
    %236 = math.exp %235 : vector<64x16xf32>
    %cst_106 = arith.constant dense<0.000000e+00> : vector<64xf32>
    %237 = vector.multi_reduction <add>, %236, %cst_106 [1] : vector<64x16xf32> to vector<64xf32>
    %238 = vector.shape_cast %237 : vector<64xf32> to vector<64x1xf32>
    %239 = tpu.reciprocal %238 {approx = true} : vector<64x1xf32> -> vector<64x1xf32>
    %240 = vector.broadcast %239 : vector<64x1xf32> to vector<64x16xf32>
    %241 = arith.mulf %236, %240 : vector<64x16xf32>
    %242 = vector.extract_strided_slice %241 {offsets = [0, 0], sizes = [16, 16], strides = [1, 1]} : vector<64x16xf32> to vector<16x16xf32>
    %243 = arith.truncf %242 : vector<16x16xf32> to vector<16x16xbf16>
    %244 = vector.extract_strided_slice %197 {offsets = [0, 0], sizes = [16, 8], strides = [1, 1]} : vector<16x32xf32> to vector<16x8xf32>
    %245 = arith.truncf %244 : vector<16x8xf32> to vector<16x8xbf16>
    %cst_107 = arith.constant dense<0.000000e+00> : vector<16x8xf32>
    %246 = tpu.matmul %243, %245, %cst_107 {dimension_numbers = #tpu.dot_dimension_numbers<[1], [0], [0], [1], [0, 0, 1, 1], [], []>} : vector<16x16xbf16>, vector<16x8xbf16>, vector<16x8xf32> -> vector<16x8xf32>
    %247 = vector.extract_strided_slice %241 {offsets = [16, 0], sizes = [16, 16], strides = [1, 1]} : vector<64x16xf32> to vector<16x16xf32>
    %248 = arith.truncf %247 : vector<16x16xf32> to vector<16x16xbf16>
    %249 = vector.extract_strided_slice %197 {offsets = [0, 8], sizes = [16, 8], strides = [1, 1]} : vector<16x32xf32> to vector<16x8xf32>
    %250 = arith.truncf %249 : vector<16x8xf32> to vector<16x8xbf16>
    %cst_108 = arith.constant dense<0.000000e+00> : vector<16x8xf32>
    %251 = tpu.matmul %248, %250, %cst_108 {dimension_numbers = #tpu.dot_dimension_numbers<[1], [0], [0], [1], [0, 0, 1, 1], [], []>} : vector<16x16xbf16>, vector<16x8xbf16>, vector<16x8xf32> -> vector<16x8xf32>
    %252 = vector.extract_strided_slice %241 {offsets = [32, 0], sizes = [16, 16], strides = [1, 1]} : vector<64x16xf32> to vector<16x16xf32>
    %253 = arith.truncf %252 : vector<16x16xf32> to vector<16x16xbf16>
    %254 = vector.extract_strided_slice %197 {offsets = [0, 16], sizes = [16, 8], strides = [1, 1]} : vector<16x32xf32> to vector<16x8xf32>
    %255 = arith.truncf %254 : vector<16x8xf32> to vector<16x8xbf16>
    %cst_109 = arith.constant dense<0.000000e+00> : vector<16x8xf32>
    %256 = tpu.matmul %253, %255, %cst_109 {dimension_numbers = #tpu.dot_dimension_numbers<[1], [0], [0], [1], [0, 0, 1, 1], [], []>} : vector<16x16xbf16>, vector<16x8xbf16>, vector<16x8xf32> -> vector<16x8xf32>
    %257 = vector.extract_strided_slice %241 {offsets = [48, 0], sizes = [16, 16], strides = [1, 1]} : vector<64x16xf32> to vector<16x16xf32>
    %258 = arith.truncf %257 : vector<16x16xf32> to vector<16x16xbf16>
    %259 = vector.extract_strided_slice %197 {offsets = [0, 24], sizes = [16, 8], strides = [1, 1]} : vector<16x32xf32> to vector<16x8xf32>
    %260 = arith.truncf %259 : vector<16x8xf32> to vector<16x8xbf16>
    %cst_110 = arith.constant dense<0.000000e+00> : vector<16x8xf32>
    %261 = tpu.matmul %258, %260, %cst_110 {dimension_numbers = #tpu.dot_dimension_numbers<[1], [0], [0], [1], [0, 0, 1, 1], [], []>} : vector<16x16xbf16>, vector<16x8xbf16>, vector<16x8xf32> -> vector<16x8xf32>
    %262 = tpu.concatenate %246, %251, %256, %261 in 1 : vector<16x8xf32>, vector<16x8xf32>, vector<16x8xf32>, vector<16x8xf32> -> vector<16x32xf32>
    %263 = arith.truncf %262 : vector<16x32xf32> to vector<16x32xbf16>
    %c1_111 = arith.constant 1 : index
    %c0_112 = arith.constant 0 : index
    %c0_113 = arith.constant 0 : index
    %264 = vector.load %arg6[%c1_111, %c0_112, %c0_113] : memref<2x32x32xbf16, #tpu.memory_space<vmem>>, vector<1x32x32xbf16>
    %265 = vector.shape_cast %264 : vector<1x32x32xbf16> to vector<32x32xbf16>
    %cst_114 = arith.constant dense<0.000000e+00> : vector<16x32xf32>
    %266 = tpu.matmul %263, %265, %cst_114 {dimension_numbers = #tpu.dot_dimension_numbers<[1], [0], [0], [1], [0, 0, 1, 1], [], []>} : vector<16x32xbf16>, vector<32x32xbf16>, vector<16x32xf32> -> vector<16x32xf32>
    %267 = arith.addf %187, %266 : vector<16x32xf32>
    %c1_115 = arith.constant 1 : index
    %c0_116 = arith.constant 0 : index
    %c0_117 = arith.constant 0 : index
    %268 = vector.load %arg7[%c1_115, %c0_116, %c0_117] : memref<2x1x32xf32, #tpu.memory_space<vmem>>, vector<1x1x32xf32>
    %269 = vector.shape_cast %268 : vector<1x1x32xf32> to vector<1x32xf32>
    %c1_118 = arith.constant 1 : index
    %c0_119 = arith.constant 0 : index
    %c0_120 = arith.constant 0 : index
    %270 = vector.load %arg8[%c1_118, %c0_119, %c0_120] : memref<2x1x32xf32, #tpu.memory_space<vmem>>, vector<1x1x32xf32>
    %271 = vector.shape_cast %270 : vector<1x1x32xf32> to vector<1x32xf32>
    %cst_121 = arith.constant dense<0.000000e+00> : vector<16xf32>
    %272 = vector.multi_reduction <add>, %267, %cst_121 [1] : vector<16x32xf32> to vector<16xf32>
    %273 = vector.shape_cast %272 : vector<16xf32> to vector<16x1xf32>
    %274 = arith.mulf %267, %267 : vector<16x32xf32>
    %cst_122 = arith.constant dense<0.000000e+00> : vector<16xf32>
    %275 = vector.multi_reduction <add>, %274, %cst_122 [1] : vector<16x32xf32> to vector<16xf32>
    %276 = vector.shape_cast %275 : vector<16xf32> to vector<16x1xf32>
    %cst_123 = arith.constant 3.125000e-02 : f32
    %277 = vector.broadcast %cst_123 : f32 to vector<16x1xf32>
    %278 = arith.mulf %273, %277 : vector<16x1xf32>
    %cst_124 = arith.constant 3.125000e-02 : f32
    %279 = vector.broadcast %cst_124 : f32 to vector<16x1xf32>
    %280 = arith.mulf %276, %279 : vector<16x1xf32>
    %281 = arith.mulf %278, %278 : vector<16x1xf32>
    %282 = arith.subf %280, %281 : vector<16x1xf32>
    %283 = vector.broadcast %278 : vector<16x1xf32> to vector<16x32xf32>
    %284 = arith.subf %267, %283 : vector<16x32xf32>
    %cst_125 = arith.constant 9.99999974E-6 : f32
    %285 = vector.broadcast %cst_125 : f32 to vector<16x1xf32>
    %286 = arith.addf %282, %285 : vector<16x1xf32>
    %287 = math.rsqrt %286 : vector<16x1xf32>
    %288 = vector.broadcast %287 : vector<16x1xf32> to vector<16x32xf32>
    %289 = arith.mulf %284, %288 : vector<16x32xf32>
    %290 = vector.broadcast %269 : vector<1x32xf32> to vector<16x32xf32>
    %291 = arith.mulf %289, %290 : vector<16x32xf32>
    %292 = vector.broadcast %271 : vector<1x32xf32> to vector<16x32xf32>
    %293 = arith.addf %291, %292 : vector<16x32xf32>
    %294 = arith.truncf %293 : vector<16x32xf32> to vector<16x32xbf16>
    %c1_126 = arith.constant 1 : index
    %c0_127 = arith.constant 0 : index
    %c0_128 = arith.constant 0 : index
    %295 = vector.load %arg9[%c1_126, %c0_127, %c0_128] : memref<2x32x128xbf16, #tpu.memory_space<vmem>>, vector<1x32x128xbf16>
    %296 = vector.shape_cast %295 : vector<1x32x128xbf16> to vector<32x128xbf16>
    %cst_129 = arith.constant dense<0.000000e+00> : vector<16x128xf32>
    %297 = tpu.matmul %294, %296, %cst_129 {dimension_numbers = #tpu.dot_dimension_numbers<[1], [0], [0], [1], [0, 0, 1, 1], [], []>} : vector<16x32xbf16>, vector<32x128xbf16>, vector<16x128xf32> -> vector<16x128xf32>
    %c1_130 = arith.constant 1 : index
    %c0_131 = arith.constant 0 : index
    %c0_132 = arith.constant 0 : index
    %298 = vector.load %arg10[%c1_130, %c0_131, %c0_132] : memref<2x1x128xf32, #tpu.memory_space<vmem>>, vector<1x1x128xf32>
    %299 = vector.shape_cast %298 : vector<1x1x128xf32> to vector<1x128xf32>
    %300 = vector.broadcast %299 : vector<1x128xf32> to vector<16x128xf32>
    %301 = arith.addf %297, %300 : vector<16x128xf32>
    %cst_133 = arith.constant 5.000000e-01 : f32
    %302 = vector.broadcast %cst_133 : f32 to vector<16x128xf32>
    %303 = arith.mulf %302, %301 : vector<16x128xf32>
    %cst_134 = arith.constant 0.707106769 : f32
    %304 = vector.broadcast %cst_134 : f32 to vector<16x128xf32>
    %305 = arith.mulf %301, %304 : vector<16x128xf32>
    %306 = math.erf %305 : vector<16x128xf32>
    %cst_135 = arith.constant 1.000000e+00 : f32
    %307 = vector.broadcast %cst_135 : f32 to vector<16x128xf32>
    %308 = arith.addf %307, %306 : vector<16x128xf32>
    %309 = arith.mulf %303, %308 : vector<16x128xf32>
    %310 = arith.truncf %309 : vector<16x128xf32> to vector<16x128xbf16>
    %c1_136 = arith.constant 1 : index
    %c0_137 = arith.constant 0 : index
    %c0_138 = arith.constant 0 : index
    %311 = vector.load %arg11[%c1_136, %c0_137, %c0_138] : memref<2x128x32xbf16, #tpu.memory_space<vmem>>, vector<1x128x32xbf16>
    %312 = vector.shape_cast %311 : vector<1x128x32xbf16> to vector<128x32xbf16>
    %cst_139 = arith.constant dense<0.000000e+00> : vector<16x32xf32>
    %313 = tpu.matmul %310, %312, %cst_139 {dimension_numbers = #tpu.dot_dimension_numbers<[1], [0], [0], [1], [0, 0, 1, 1], [], []>} : vector<16x128xbf16>, vector<128x32xbf16>, vector<16x32xf32> -> vector<16x32xf32>
    %c1_140 = arith.constant 1 : index
    %c0_141 = arith.constant 0 : index
    %c0_142 = arith.constant 0 : index
    %314 = vector.load %arg12[%c1_140, %c0_141, %c0_142] : memref<2x1x32xf32, #tpu.memory_space<vmem>>, vector<1x1x32xf32>
    %315 = vector.shape_cast %314 : vector<1x1x32xf32> to vector<1x32xf32>
    %316 = vector.broadcast %315 : vector<1x32xf32> to vector<16x32xf32>
    %317 = arith.addf %313, %316 : vector<16x32xf32>
    %318 = arith.addf %293, %317 : vector<16x32xf32>
    %c0_143 = arith.constant 0 : index
    %c0_144 = arith.constant 0 : index
    %319 = vector.load %arg17[%c0_143, %c0_144] : memref<1x32xf32, #tpu.memory_space<vmem>>, vector<1x32xf32>
    %c0_145 = arith.constant 0 : index
    %c0_146 = arith.constant 0 : index
    %320 = vector.load %arg18[%c0_145, %c0_146] : memref<1x32xf32, #tpu.memory_space<vmem>>, vector<1x32xf32>
    %cst_147 = arith.constant dense<0.000000e+00> : vector<16xf32>
    %321 = vector.multi_reduction <add>, %318, %cst_147 [1] : vector<16x32xf32> to vector<16xf32>
    %322 = vector.shape_cast %321 : vector<16xf32> to vector<16x1xf32>
    %323 = arith.mulf %318, %318 : vector<16x32xf32>
    %cst_148 = arith.constant dense<0.000000e+00> : vector<16xf32>
    %324 = vector.multi_reduction <add>, %323, %cst_148 [1] : vector<16x32xf32> to vector<16xf32>
    %325 = vector.shape_cast %324 : vector<16xf32> to vector<16x1xf32>
    %cst_149 = arith.constant 3.125000e-02 : f32
    %326 = vector.broadcast %cst_149 : f32 to vector<16x1xf32>
    %327 = arith.mulf %322, %326 : vector<16x1xf32>
    %cst_150 = arith.constant 3.125000e-02 : f32
    %328 = vector.broadcast %cst_150 : f32 to vector<16x1xf32>
    %329 = arith.mulf %325, %328 : vector<16x1xf32>
    %330 = arith.mulf %327, %327 : vector<16x1xf32>
    %331 = arith.subf %329, %330 : vector<16x1xf32>
    %332 = vector.broadcast %327 : vector<16x1xf32> to vector<16x32xf32>
    %333 = arith.subf %318, %332 : vector<16x32xf32>
    %cst_151 = arith.constant 9.99999974E-6 : f32
    %334 = vector.broadcast %cst_151 : f32 to vector<16x1xf32>
    %335 = arith.addf %331, %334 : vector<16x1xf32>
    %336 = math.rsqrt %335 : vector<16x1xf32>
    %337 = vector.broadcast %336 : vector<16x1xf32> to vector<16x32xf32>
    %338 = arith.mulf %333, %337 : vector<16x32xf32>
    %339 = vector.broadcast %319 : vector<1x32xf32> to vector<16x32xf32>
    %340 = arith.mulf %338, %339 : vector<16x32xf32>
    %341 = vector.broadcast %320 : vector<1x32xf32> to vector<16x32xf32>
    %342 = arith.addf %340, %341 : vector<16x32xf32>
    %343 = arith.truncf %342 : vector<16x32xf32> to vector<16x32xbf16>
    %c0_152 = arith.constant 0 : index
    %c0_153 = arith.constant 0 : index
    %344 = vector.load %arg19[%c0_152, %c0_153] : memref<32x128xbf16, #tpu.memory_space<vmem>>, vector<32x128xbf16>
    %cst_154 = arith.constant dense<0.000000e+00> : vector<16x128xf32>
    %345 = tpu.matmul %343, %344, %cst_154 {dimension_numbers = #tpu.dot_dimension_numbers<[1], [0], [0], [1], [0, 0, 1, 1], [], []>} : vector<16x32xbf16>, vector<32x128xbf16>, vector<16x128xf32> -> vector<16x128xf32>
    %c0_155 = arith.constant 0 : index
    %c0_156 = arith.constant 0 : index
    %346 = vector.load %arg20[%c0_155, %c0_156] : memref<16x128xf32, #tpu.memory_space<vmem>>, vector<16x128xf32>
    tpu.vector_store %arg20[%c0_155, %c0_156], %345 {strides = array<i32>} : memref<16x128xf32, #tpu.memory_space<vmem>>, vector<16x128xf32>,
    return
  }
}

</mosaic_0001>

<bundles_post_ra>
// kernel: tpu_custom_call.1
= control target key start
LH: loop header
LB: loop body
LE: loop exit
PB: predicated region body
PF: predicated region fallthrough
CT: control target
= control target key end

     0   :  { %s4230_s0 = inlined_call_operand.vmem [shape: f32[16,32], index: 0, kind: input, shape index: {}]   ;;  %s4231_s1 = inlined_call_operand.hbm [shape: f32[2,1,32], index: 1, kind: input, shape index: {}]   ;;  %s4232_s2 = inlined_call_operand.hbm [shape: f32[2,1,32], index: 2, kind: input, shape index: {}]   ;;  %s4233_s3 = inlined_call_operand.vmem [shape: bf16[2,32,32], index: 3, kind: input, shape index: {}]   ;;  %s4234_s4 = inlined_call_operand.vmem [shape: bf16[2,32,32], index: 4, kind: input, shape index: {}]   ;;  %s4235_s5 = inlined_call_operand.vmem [shape: bf16[2,32,32], index: 5, kind: input, shape index: {}]   ;;  %s4236_s6 = inlined_call_operand.vmem [shape: bf16[2,32,32], index: 6, kind: input, shape index: {}]   ;;  %s4237_s7 = inlined_call_operand.hbm [shape: f32[2,1,32], index: 7, kind: input, shape index: {}]   ;;  %s4238_s8 = inlined_call_operand.hbm [shape: f32[2,1,32], index: 8, kind: input, shape index: {}]   ;;  %s4239_s9 = inlined_call_operand.vmem [shape: bf16[2,32,128], index: 9, kind: input, shape index: {}]   ;;  %s4240_s10 = inlined_call_operand.hbm [shape: f32[2,1,128], index: 10, kind: input, shape index: {}]   ;;  %s4241_s11 = inlined_call_operand.vmem [shape: bf16[2,128,32], index: 11, kind: input, shape index: {}]   ;;  %s4242_s12 = inlined_call_operand.hbm [shape: f32[2,1,32], index: 12, kind: input, shape index: {}]   ;;  %s4243_s13 = inlined_call_operand.vmem [shape: f32[16,32], index: 13, kind: input, shape index: {}]   ;;  %s4244_s14 = inlined_call_operand.vmem [shape: f32[16,32], index: 14, kind: input, shape index: {}]   ;;  %s4245_s15 = inlined_call_operand.vmem [shape: bf16[32,32], index: 15, kind: input, shape index: {}]   ;;  %s4246_s16 = inlined_call_operand.vmem [shape: f32[64,16], index: 16, kind: input, shape index: {}]   ;;  %s4247_s17 = inlined_call_operand.vmem [shape: f32[1,32], index: 17, kind: input, shape index: {}]   ;;  %s4248_s18 = inlined_call_operand.vmem [shape: f32[1,32], index: 18, kind: input, shape index: {}]   ;;  %s4249_s19 = inlined_call_operand.vmem [shape: bf16[32,128], index: 19, kind: input, shape index: {}]   ;;  %s4250_s20 = inlined_call_operand.hbm [shape: f32[16,128], index: 20, kind: output, shape index: {}]  }
   0x1   :  { %4257 = sst [smem:[#allocation19_spill]] %s4230_s0 }
   0x2   :  { %4258 = sst [smem:[#allocation20_spill]] %s4231_s1 }
   0x3   :  { %4259 = sst [smem:[#allocation21_spill]] %s4232_s2 }
   0x4   :  { %4260 = sst [smem:[#allocation22_spill]] %s4233_s3 }
   0x5   :  { %4261 = sst [smem:[#allocation23_spill]] %s4234_s4 }
   0x6   :  { %4262 = sst [smem:[#allocation24_spill]] %s4248_s18 }
   0x7   :  { %4263 = sst [smem:[#allocation25_spill]] %s4250_s20 }
   0x8   :  { %25 = vsyncpa [#allocation3], 0 }
   0x9   :  { %26 = vsyncpa [#allocation6], 0 }
   0xa   :  { %27 = vsyncpa [#allocation9], 0 }
   0xb   :  { %28 = vsyncpa [#allocation12], 0 }
   0xc   :  { %29 = vsyncpa [#allocation4], 0  ;;  %s3457_s1 = smov [#allocation5]   ;;  %s3458_s23 = smov [#allocation8]  }
   0xd   :  { %s49_s22 = sshll.u32 %s3457_s1, 4  ;;  %s81_s24 = sshll.u32 %s3458_s23, 4  ;;  %s50_s22 = int_to_ptr.vmem [resolvable:$true] %s49_s22  ;;  %s3579_s24 = int_to_ptr.vmem [resolvable:$true] %s81_s24 }
   0xe   :  { %s4264_s3 = sld [smem:[#allocation21_spill]] }
  0x14   :  { %s3293_s26 = scalar_lea.hbm %s4264_s3, 32 }
  0x15   :  { %p3294_p0 = scmp.ne.s32.totalorder %s4264_s3, %s3293_s26  ;;  %p3297_p1 = scmp.lt.u32.totalorder %s3293_s26, %s4264_s3 }
  0x17   :  { %p3299_p2 = pnand %p3297_p1, %p3294_p0 }
  0x19   :  { %3302 = shalt.err (!%p3299_p2)
}
  0x1a   :  { %s3303_s30 = scalar_lea.vmem %s50_s22, 32  ;;  %p3308_p4 = scmp.lt.s32.totalorder %s50_s22, %s50_s22 }
  0x1b   :  { %p3304_p3 = scmp.ne.s32.totalorder %s50_s22, %s3303_s30  ;;  %p3309_p5 = scmp.lt.s32.totalorder %s3303_s30, %s3303_s30 }
  0x1d   :  { %p3310_p6 = por %p3309_p5, %p3308_p4 }
  0x1f   :  { %p3311_p7 = pnand %p3310_p6, %p3304_p3 }
  0x21   :  { %3314 = shalt.err (!%p3311_p7)
}
  0x22   :  { %s3459_s0 = smov 16   ;;  %s3460_s21 = smov 1  }
  0x23   :  { %55 = dma.hbm_to_vmem [thread:$0]  %s4264_s3, 32, %s50_s22, [#allocation6], %s3459_s0, %s3459_s0, %s3460_s21  }
  0x24   :  { %s3315_s26 = scalar_lea.hbm %s4238_s8, 32 }
  0x25   :  { %p3316_p8 = scmp.ne.s32.totalorder %s4238_s8, %s3315_s26  ;;  %p3319_p9 = scmp.lt.u32.totalorder %s3315_s26, %s4238_s8 }
  0x27   :  { %p3321_p10 = pnand %p3319_p9, %p3316_p8 }
  0x29   :  { %3324 = shalt.err (!%p3321_p10)
}
  0x2a   :  { %s3325_s30 = scalar_lea.vmem %s3579_s24, 32  ;;  %p3330_p12 = scmp.lt.s32.totalorder %s3579_s24, %s3579_s24 }
  0x2b   :  { %p3326_p11 = scmp.ne.s32.totalorder %s3579_s24, %s3325_s30  ;;  %p3331_p13 = scmp.lt.s32.totalorder %s3325_s30, %s3325_s30 }
  0x2d   :  { %p3332_p0 = por %p3331_p13, %p3330_p12 }
  0x2f   :  { %p3333_p1 = pnand %p3332_p0, %p3326_p11 }
  0x31   :  { %3336 = shalt.err (!%p3333_p1)
}
  0x32   :  { %87 = dma.hbm_to_vmem [thread:$0]  %s4238_s8, 32, %s3579_s24, [#allocation9], %s3459_s0, %s3459_s0, %s3460_s21  }
  0x33   :  { %s3461_s1 = smov [#allocation2]   ;;  %s3462_s2 = smov [#allocation7]  }
  0x34   :  { %s37_s23 = sshll.u32 %s3461_s1, 4  ;;  %s69_s25 = sshll.u32 %s3462_s2, 4  ;;  %s38_s23 = int_to_ptr.vmem [resolvable:$true] %s37_s23  ;;  %s3616_s25 = int_to_ptr.vmem [resolvable:$true] %s69_s25 }
  0x35   :  { %s4265_s28 = sld [smem:[#allocation20_spill]] }
  0x3b   :  { %s3337_s4 = scalar_lea.hbm %s4265_s28, 32 }
  0x3c   :  { %p3338_p2 = scmp.ne.s32.totalorder %s4265_s28, %s3337_s4  ;;  %p3341_p3 = scmp.lt.u32.totalorder %s3337_s4, %s4265_s28 }
  0x3e   :  { %p3343_p4 = pnand %p3341_p3, %p3338_p2 }
  0x40   :  { %3346 = shalt.err (!%p3343_p4)
}
  0x41   :  { %s3347_s8 = scalar_lea.vmem %s38_s23, 32  ;;  %p3352_p6 = scmp.lt.s32.totalorder %s38_s23, %s38_s23 }
  0x42   :  { %p3348_p5 = scmp.ne.s32.totalorder %s38_s23, %s3347_s8  ;;  %p3353_p7 = scmp.lt.s32.totalorder %s3347_s8, %s3347_s8 }
  0x44   :  { %p3354_p8 = por %p3353_p7, %p3352_p6 }
  0x46   :  { %p3355_p9 = pnand %p3354_p8, %p3348_p5 }
  0x48   :  { %3358 = shalt.err (!%p3355_p9)
}
  0x49   :  { %43 = dma.hbm_to_vmem [thread:$0]  %s4265_s28, 32, %s38_s23, [#allocation3], %s3459_s0, %s3459_s0, %s3460_s21  }
  0x4a   :  { %s3359_s18 = scalar_lea.hbm %s4237_s7, 32 }
  0x4b   :  { %p3360_p10 = scmp.ne.s32.totalorder %s4237_s7, %s3359_s18  ;;  %p3363_p11 = scmp.lt.u32.totalorder %s3359_s18, %s4237_s7 }
  0x4d   :  { %p3365_p12 = pnand %p3363_p11, %p3360_p10 }
  0x4f   :  { %3368 = shalt.err (!%p3365_p12)
}
  0x50   :  { %s3369_s4 = scalar_lea.vmem %s3616_s25, 32  ;;  %p3374_p0 = scmp.lt.s32.totalorder %s3616_s25, %s3616_s25 }
  0x51   :  { %p3370_p13 = scmp.ne.s32.totalorder %s3616_s25, %s3369_s4  ;;  %p3375_p1 = scmp.lt.s32.totalorder %s3369_s4, %s3369_s4 }
  0x53   :  { %p3376_p2 = por %p3375_p1, %p3374_p0 }
  0x55   :  { %p3377_p3 = pnand %p3376_p2, %p3370_p13 }
  0x57   :  { %3380 = shalt.err (!%p3377_p3)
}
  0x58   :  { %75 = dma.hbm_to_vmem [thread:$0]  %s4237_s7, 32, %s3616_s25, [#allocation6], %s3459_s0, %s3459_s0, %s3460_s21  }
  0x59   :  { %s3463_s29 = smov [#allocation10]   ;;  %s3464_s8 = smov [#allocation11]  }
  0x5a   :  { %s95_s30 = sshll.u32 %s3463_s29, 4  ;;  %s109_s24 = sshll.u32 %s3464_s8, 4  ;;  %s96_s30 = int_to_ptr.vmem [resolvable:$true] %s95_s30  ;;  %s3653_s24 = int_to_ptr.vmem [resolvable:$true] %s109_s24 }
  0x5b   :  { %s3381_s1 = scalar_lea.hbm %s4240_s10, 32 }
  0x5c   :  { %p3382_p4 = scmp.ne.s32.totalorder %s4240_s10, %s3381_s1  ;;  %p3385_p5 = scmp.lt.u32.totalorder %s3381_s1, %s4240_s10 }
  0x5e   :  { %p3387_p6 = pnand %p3385_p5, %p3382_p4 }
  0x60   :  { %3390 = shalt.err (!%p3387_p6)
}
  0x61   :  { %s3391_s7 = scalar_lea.vmem %s96_s30, 32  ;;  %p3396_p8 = scmp.lt.s32.totalorder %s96_s30, %s96_s30 }
  0x62   :  { %p3392_p7 = scmp.ne.s32.totalorder %s96_s30, %s3391_s7  ;;  %p3397_p9 = scmp.lt.s32.totalorder %s3391_s7, %s3391_s7 }
  0x64   :  { %p3398_p10 = por %p3397_p9, %p3396_p8 }
  0x66   :  { %p3399_p11 = pnand %p3398_p10, %p3392_p7 }
  0x68   :  { %3402 = shalt.err (!%p3399_p11)
}
  0x69   :  { %101 = dma.hbm_to_vmem [thread:$0]  %s4240_s10, 32, %s96_s30, [#allocation9], %s3459_s0, %s3459_s0, %s3460_s21  }
  0x6a   :  { %s3403_s28 = scalar_lea.hbm %s4242_s12, 32 }
  0x6b   :  { %p3404_p12 = scmp.ne.s32.totalorder %s4242_s12, %s3403_s28  ;;  %p3407_p13 = scmp.lt.u32.totalorder %s3403_s28, %s4242_s12 }
  0x6d   :  { %p3409_p0 = pnand %p3407_p13, %p3404_p12 }
  0x6f   :  { %3412 = shalt.err (!%p3409_p0)
}
  0x70   :  { %s3413_s1 = scalar_lea.vmem %s3653_s24, 32  ;;  %p3418_p2 = scmp.lt.s32.totalorder %s3653_s24, %s3653_s24 }
  0x71   :  { %p3414_p1 = scmp.ne.s32.totalorder %s3653_s24, %s3413_s1  ;;  %p3419_p3 = scmp.lt.s32.totalorder %s3413_s1, %s3413_s1 }
  0x73   :  { %p3420_p4 = por %p3419_p3, %p3418_p2 }
  0x75   :  { %p3421_p5 = pnand %p3420_p4, %p3414_p1 }
  0x77   :  { %3424 = shalt.err (!%p3421_p5)
}
  0x78   :  { %115 = dma.hbm_to_vmem [thread:$0]  %s4242_s12, 32, %s3653_s24, [#allocation12], %s3459_s0, %s3459_s0, %s3460_s21  }
  0x79   :  { %3447 = dma.done.wait [#allocation3], 32  }
  0x7a   :  { %3448 = vsyncadd [#allocation3], 4294967264 }
  0x7b   :  { %3449 = dma.done.wait [#allocation6], 64  }
  0x7c   :  { %3450 = vsyncadd [#allocation6], 4294967232 }
  0x7d   :  { %3451 = dma.done.wait [#allocation9], 64  }
  0x7e   :  { %3452 = vsyncadd [#allocation9], 4294967232 }
  0x7f   :  { %3453 = dma.done.wait [#allocation12], 32  }
  0x80   :  { %3454 = vsyncadd [#allocation12], 4294967264  ;;  %vm169_vm0 = vcmask 261120   ;;  %s4266_s2 = sld [smem:[#allocation19_spill]]  ;;  %s4267_s24 = sld [smem:[#allocation22_spill]]  ;;  %v3162_v9 = vld [vmem:[%s4235_s5] sm:$0xff]  }
  0x81   :  { %v3465_v10 = vmov 0.0   ;;  %v3164_v12 = vld [vmem:[%s4235_s5 + $0x8] sm:$0xff]   ;;  %vm3466_vm1 = vmmov 0   ;;  %v2642_v30 = vld [vmem:[#allocation2] ss:$0 sm:$0xff]  ;;  %s4268_s3 = sld [smem:[#allocation23_spill]] }
  0x82   :  { %2858 = vmatprep.subr.bf16.mxu1 %v3465_v10  ;;  %2874 = vmatprep.subr.bf16.mxu0 %v3465_v10  ;;  %v2643_v35 = vld [vmem:[#allocation5] ss:$0 sm:$0xff]  ;;  %v3757_v43 = vld [vmem:[%s4245_s15 + $0x8] sm:$0xff]   ;;  %vm507_vm2 = vcmask 64512   ;;  %s3469_s23 = smov 104   ;;  %vm726_vm3 = vcmask 130048  }
  0x83   :  { %2875 = vmatpush3.bf16.msra.mxu0 %v3162_v9  ;;  %2862 = vmatprep.mubr.msk.bf16.mxu1 %vm3466_vm1, %v3465_v10  ;;  %v3736_v41 = vld [vmem:[%s4245_s15] sm:$0xff]   ;;  %v3784_v61 = vld [vmem:[%s4243_s13 + $0x8] sm:$0xff]  ;;  %s3470_s4 = smov 8   ;;  %s3471_s8 = smov 24   ;;  %vm1034_vm4 = vcmask 195584  }
  0x84   :  { %2876 = vmatprep.subr.bf16.mxu0 %v3465_v10  ;;  %2878 = vmatprep.mubr.msk.bf16.mxu0 %vm3466_vm1, %v3465_v10  ;;  %v3774_v59 = vld [vmem:[%s4243_s13] sm:$0xff]  ;;  %v3789_v63 = vld [vmem:[%s4244_s14 + $0x8] sm:$0xff]  ;;  %s3467_s13 = smov 120  }
  0x85   :  { %v3779_v60 = vld [vmem:[%s4244_s14] sm:$0xff]  ;;  %s3468_s14 = smov 112  }
  0x86   :  { %v149_v0 = vld [vmem:[%s4266_s2] sm:$0xff]  ;;  %v150_v1 = vld [vmem:[%s4266_s2 + $0x8] sm:$0xff] }
  0x87   :  { %v170_v2 = vsel %vm169_vm0, %v149_v0, 0.0  ;;  %v176_v3 = vmul.f32 %v149_v0, %v149_v0  ;;  %v173_v4 = vsel %vm169_vm0, %v150_v1, 0.0  ;;  %v177_v5 = vmul.f32 %v150_v1, %v150_v1  ;;  %v3161_v8 = vld [vmem:[%s4267_s24] sm:$0xff]   ;;  %v3163_v11 = vld [vmem:[%s4267_s24 + $0x8] sm:$0xff]   ;;  %2877 = vmatpush3.bf16.msra.mxu0 %v3164_v12 }
  0x88   :  { %171 = vadd.xlane.f32.xlu0 %v170_v2  ;;  %2859 = vmatpush3.bf16.msra.mxu1 %v3161_v8  ;;  %v3165_v39 = vld [vmem:[%s4268_s3] sm:$0xff]   ;;  %v3166_v42 = vld [vmem:[%s4268_s3 + $0x8] sm:$0xff]  }
  0x89   :  { %v178_v6 = vsel %vm169_vm0, %v176_v3, 0.0  ;;  %v181_v7 = vsel %vm169_vm0, %v177_v5, 0.0  ;;  %2860 = vmatprep.subr.bf16.mxu1 %v3465_v10  ;;  %2890 = vmatprep.subr.bf16.mxu0 %v3465_v10 }
  0x8a   :  { %179 = vadd.xlane.f32.xlu1 %v178_v6 }
  0x8c   :  { %174 = vadd.xlane.f32.xlu0 %v173_v4  ;;  %2861 = vmatpush3.bf16.msra.mxu1 %v3163_v11 }
  0x8d   :  { %2866 = vmatprep.subr.bf16.mxu1 %v3465_v10 }
  0x8e   :  { %182 = vadd.xlane.f32.xlu1 %v181_v7 }
 0x115   :  { %v172_v13 = vpop.xlane.xlu0 %171 }
 0x116   :  { %v184_v14 = vmul.f32 0.03125, %v172_v13 }
 0x117   :  { %v180_v15 = vpop.xlane.xlu1 %179 }
 0x118   :  { %v188_v16 = vmul.f32 %v184_v14, %v184_v14  ;;  %v186_v17 = vmul.f32 0.03125, %v180_v15  ;;  %v192_v27 = vsub.f32 %v149_v0, %v184_v14 }
 0x119   :  { %v175_v18 = vpop.xlane.xlu0 %174 }
 0x11a   :  { %v190_v19 = vsub.f32 %v186_v17, %v188_v16  ;;  %v185_v20 = vmul.f32 0.03125, %v175_v18 }
 0x11b   :  { %v183_v21 = vpop.xlane.xlu1 %182 }
 0x11c   :  { %v194_v22 = vadd.f32 1e-05, %v190_v19  ;;  %v189_v23 = vmul.f32 %v185_v20, %v185_v20  ;;  %v187_v24 = vmul.f32 0.03125, %v183_v21  ;;  %v193_v31 = vsub.f32 %v150_v1, %v185_v20 }
 0x11e   :  { %3201 = vrsqrt.f32 %v194_v22  ;;  %v191_v25 = vsub.f32 %v187_v24, %v189_v23 }
 0x120   :  { %v195_v26 = vadd.f32 1e-05, %v191_v25 }
 0x122   :  { %3203 = vrsqrt.f32 %v195_v26 }
 0x128   :  { %v3202_v28 = vpop.eup %3201 }
 0x129   :  { %v198_v29 = vmul.f32 %v3202_v28, %v192_v27 }
 0x12b   :  { %v206_v34 = vmul.f32 %v2642_v30, %v198_v29 }
 0x12c   :  { %v3204_v32 = vpop.eup %3203 }
 0x12d   :  { %v199_v33 = vmul.f32 %v3204_v32, %v193_v31  ;;  %v3722_v37 = vadd.f32 %v2643_v35, %v206_v34 }
 0x12f   :  { %v207_v36 = vmul.f32 %v2642_v30, %v199_v33  ;;  %v3830_v33 = vld [vmem:[%s4246_s16] sm:$0xff] }
 0x131   :  { %v3724_v38 = vadd.f32 %v2643_v35, %v207_v36 }
 0x133   :  { %v216_v40 = vpack.c.bf16 %v3724_v38, %v3722_v37 }
 0x135   :  { %2863 = vmatmul.mubr.msk.bf16.vlgmr.msra.gmra.mrb[0].mxu1 %vm169_vm0, %v216_v40  ;;  %2879 = vmatmul.mubr.msk.bf16.vlgmr.msra.gmra.mrb[0].mxu0 %vm169_vm0, %v216_v40 }
 0x136   :  { %2867 = vmatpush3.bf16.msra.mxu1 %v3165_v39  ;;  %2870 = vmatprep.mubr.msk.bf16.mxu1 %vm3466_vm1, %v3465_v10  ;;  %v3835_v39 = vld [vmem:[%s4246_s16 + $0x8] sm:$0xff] }
 0x137   :  { %2868 = vmatprep.subr.bf16.mxu1 %v3465_v10  ;;  %2891 = vmatpush3.bf16.msra.mxu0 %v3736_v41 }
 0x138   :  { %2892 = vmatprep.subr.bf16.mxu0 %v3465_v10  ;;  %2894 = vmatprep.mubr.msk.bf16.mxu0 %vm3466_vm1, %v3465_v10 }
 0x13a   :  { %2869 = vmatpush3.bf16.msra.mxu1 %v3166_v42 }
 0x13b   :  { %2882 = vmatprep.subr.bf16.mxu1 %v3465_v10  ;;  %2893 = vmatpush3.bf16.msra.mxu0 %v3757_v43 }
 0x13c   :  { %2904 = vmatprep.subr.bf16.mxu0 %v3465_v10 }
 0x13d   :  { %2871 = vmatmul.mubr.msk.bf16.vlgmr.msra.gmra.mrb[4].mxu1 %vm169_vm0, %v216_v40 }
 0x13e   :  { %2883 = vmatpush3.bf16.msra.mxu1 %v3736_v41  ;;  %2886 = vmatprep.mubr.msk.bf16.mxu1 %vm3466_vm1, %v3465_v10 }
 0x13f   :  { %2884 = vmatprep.subr.bf16.mxu1 %v3465_v10 }
 0x142   :  { %2885 = vmatpush3.bf16.msra.mxu1 %v3757_v43 }
 0x143   :  { %2898 = vmatprep.subr.bf16.mxu1 %v3465_v10 }
 0x208   :  { %v270_v44 = vpop.f32.mrb[0].mxu1  ;;  %v384_v45 = vpop.f32.mrb[0].mxu0 }
 0x209   :  { %v2864_v46 = vpop.f32.mrb[1].mxu1  ;;  %v2880_v47 = vpop.f32.mrb[1].mxu0  ;;  %v391_v0 = vmul.f32 %v270_v44, %v3774_v59 }
 0x20a   :  { %v273_v48 = vpop.f32.mrb[2].mxu1  ;;  %v387_v49 = vpop.f32.mrb[2].mxu0 }
 0x20b   :  { %v393_v50 = vpack.c.bf16 %v273_v48, %v270_v44  ;;  %v3763_v51 = vpack.c.bf16 %v387_v49, %v384_v45  ;;  %v2865_v52 = vpop.f32.mrb[3].mxu1  ;;  %v2881_v53 = vpop.f32.mrb[3].mxu0  ;;  %v392_v4 = vmul.f32 %v273_v48, %v3784_v61 }
 0x20d   :  { %2887 = vmatmul.mubr.msk.bf16.vlgmr.msra.gmra.mrb[8].mxu1 %vm169_vm0, %v393_v50  ;;  %v3844_v50 = vld [vmem:[%s4246_s16 + $0x10] sm:$0xff] }
 0x20e   :  { %2900 = vmatprep.mubr.msk.bf16.mxu1 %vm3466_vm1, %v3465_v10 }
 0x210   :  { %v327_v54 = vpop.f32.mrb[4].mxu1 }
 0x211   :  { %v2872_v55 = vpop.f32.mrb[5].mxu1  ;;  %v454_v12 = vmul.f32 %v327_v54, %v3774_v59 }
 0x212   :  { %v330_v56 = vpop.f32.mrb[6].mxu1 }
 0x213   :  { %v456_v57 = vpack.c.bf16 %v330_v56, %v327_v54  ;;  %v2873_v58 = vpop.f32.mrb[7].mxu1  ;;  %v455_v16 = vmul.f32 %v330_v56, %v3784_v61 }
 0x214   :  { %v3854_v58 = vld [vmem:[%s4246_s16 + $0x18] sm:$0xff] }
 0x215   :  { %2895 = vmatmul.mubr.msk.bf16.vlgmr.msra.gmra.mrb[4].mxu0 %vm169_vm0, %v456_v57  ;;  %v3849_v57 = vld [vmem:[%s4246_s16 + $0x28] sm:$0xff] }
 0x216   :  { %2906 = vmatprep.mubr.msk.bf16.mxu0 %vm3466_vm1, %v3465_v10 }
 0x2e0   :  { %v443_v62 = vpop.f32.mrb[8].mxu1 }
 0x2e1   :  { %v450_v1 = vmul.f32 %v443_v62, %v3779_v60  ;;  %v2888_v2 = vpop.f32.mrb[9].mxu1 }
 0x2e2   :  { %v446_v3 = vpop.f32.mrb[10].mxu1 }
 0x2e3   :  { %v452_v5 = vadd.f32 %v450_v1, %v391_v0  ;;  %v451_v6 = vmul.f32 %v446_v3, %v3789_v63  ;;  %v2889_v7 = vpop.f32.mrb[11].mxu1 }
 0x2e5   :  { %v453_v8 = vadd.f32 %v451_v6, %v392_v4 }
 0x2e7   :  { %v505_v9 = vpack.c.bf16 %v453_v8, %v452_v5  ;;  %v3863_v8 = vld [vmem:[%s4246_s16 + $0x20] sm:$0xff] }
 0x2e8   :  { %v494_v11 = vpop.f32.mrb[4].mxu0 }
 0x2e9   :  { %v501_v13 = vmul.f32 %v494_v11, %v3779_v60  ;;  %v2896_v14 = vpop.f32.mrb[5].mxu0  ;;  %556 = vrot.lane.b32.xlu1 %v505_v9, %s3467_s13 }
 0x2ea   :  { %v497_v15 = vpop.f32.mrb[6].mxu0 }
 0x2eb   :  { %v503_v17 = vadd.f32 %v501_v13, %v454_v12  ;;  %v502_v18 = vmul.f32 %v497_v15, %v3789_v63  ;;  %v2897_v19 = vpop.f32.mrb[7].mxu0 }
 0x2ed   :  { %v504_v20 = vadd.f32 %v502_v18, %v455_v16  ;;  %v3876_v18 = vld [vmem:[%s4246_s16 + $0x30] sm:$0xff] }
 0x2ef   :  { %v506_v21 = vpack.c.bf16 %v504_v20, %v503_v17  ;;  %v3871_v17 = vld [vmem:[%s4246_s16 + $0x38] sm:$0xff] }
 0x2f1   :  { %559 = vrot.lane.b32.xlu0 %v506_v21, %s3467_s13  ;;  %610 = vrot.lane.b32.xlu1 %v506_v21, %s3468_s14  ;;  %v512_v22 = vsel %vm507_vm2, %v506_v21, 0 }
 0x2f2   :  { %2899 = vmatpush3.bf16.xpose.msra.mxu1 %v512_v22 }
 0x2f3   :  { %2910 = vmatprep.subr.bf16.mxu1 %v3465_v10 }
 0x2f5   :  { %608 = vrot.lane.b32.xlu0 %v505_v9, %s3468_s14  ;;  %661 = vrot.lane.b32.xlu1 %v506_v21, %s3469_s23 }
 0x2f9   :  { %659 = vrot.lane.b32.xlu1 %v505_v9, %s3469_s23  ;;  %2901 = vmatmul.mubr.msk.bf16.vlgmr.msra.gmra.mrb[12].mxu1 %vm507_vm2, %v505_v9 }
 0x2fa   :  { %2912 = vmatprep.mubr.msk.bf16.mxu1 %vm3466_vm1, %v3465_v10 }
 0x35b   :  { %v557_v23 = vpop.permute.xlu1 %556 }
 0x363   :  { %v560_v24 = vpop.permute.xlu0 %559  ;;  %v611_v25 = vpop.permute.xlu1 %610 }
 0x364   :  { %v565_v26 = vsel %vm507_vm2, %v560_v24, 0  ;;  %v616_v27 = vsel %vm507_vm2, %v611_v25, 0 }
 0x365   :  { %2905 = vmatpush3.bf16.xpose.msra.mxu0 %v565_v26  ;;  %2911 = vmatpush3.bf16.xpose.msra.mxu1 %v616_v27 }
 0x366   :  { %2916 = vmatprep.subr.bf16.mxu0 %v3465_v10  ;;  %2922 = vmatprep.subr.bf16.mxu1 %v3465_v10 }
 0x367   :  { %v662_v28 = vpop.permute.xlu1 %661  ;;  %v609_v29 = vpop.permute.xlu0 %608 }
 0x368   :  { %v667_v30 = vsel %vm507_vm2, %v662_v28, 0 }
 0x36b   :  { %v660_v31 = vpop.permute.xlu1 %659 }
 0x36c   :  { %2907 = vmatmul.mubr.msk.bf16.vlgmr.msra.gmra.mrb[8].mxu0 %vm507_vm2, %v557_v23  ;;  %2913 = vmatmul.mubr.msk.bf16.vlgmr.msra.gmra.mrb[16].mxu1 %vm507_vm2, %v609_v29 }
 0x36d   :  { %2917 = vmatpush3.bf16.xpose.msra.mxu0 %v667_v30  ;;  %2923 = vmatpush3.bf16.msra.mxu1 %v3763_v51 }
 0x36e   :  { %2918 = vmatprep.mubr.msk.bf16.mxu0 %vm3466_vm1, %v3465_v10  ;;  %2924 = vmatprep.mubr.msk.bf16.mxu1 %vm3466_vm1, %v3465_v10 }
 0x36f   :  { %2934 = vmatprep.subr.bf16.mxu1 %v3465_v10  ;;  %2928 = vmatprep.subr.bf16.mxu0 %v3465_v10 }
 0x374   :  { %2919 = vmatmul.mubr.msk.bf16.vlgmr.msra.gmra.mrb[12].mxu0 %vm507_vm2, %v660_v31 }
 0x375   :  { %2930 = vmatprep.mubr.msk.bf16.mxu0 %vm3466_vm1, %v3465_v10 }
 0x3cc   :  { %v548_v32 = vpop.f32.mrb[12].mxu1 }
 0x3cd   :  { %v710_v34 = vmul.f32 0.35355338, %v548_v32  ;;  %v2902_v35 = vpop.f32.mrb[13].mxu1 }
 0x3ce   :  { %v551_v36 = vpop.f32.mrb[14].mxu1 }
 0x3cf   :  { %v711_v40 = vmul.f32 0.35355338, %v551_v36  ;;  %v2903_v42 = vpop.f32.mrb[15].mxu1  ;;  %v718_v44 = vadd.f32 %v710_v34, %v3830_v33 }
 0x3d1   :  { %v727_v45 = vsel %vm726_vm3, %v718_v44, -inf  ;;  %v719_v46 = vadd.f32 %v711_v40, %v3835_v39 }
 0x3d2   :  { %728 = vmax.xlane.f32.xlu0 %v727_v45 }
 0x3d3   :  { %v730_v47 = vsel %vm726_vm3, %v719_v46, -inf }
 0x3d4   :  { %731 = vmax.xlane.f32.xlu1 %v730_v47 }
 0x43f   :  { %v601_v48 = vpop.f32.mrb[8].mxu0  ;;  %v652_v49 = vpop.f32.mrb[16].mxu1 }
 0x440   :  { %v712_v52 = vmul.f32 0.35355338, %v601_v48  ;;  %v2908_v53 = vpop.f32.mrb[9].mxu0  ;;  %v2914_v54 = vpop.f32.mrb[17].mxu1  ;;  %v714_v4 = vmul.f32 0.35355338, %v652_v49 }
 0x441   :  { %v604_v55 = vpop.f32.mrb[10].mxu0  ;;  %v655_v56 = vpop.f32.mrb[18].mxu1 }
 0x442   :  { %v713_v62 = vmul.f32 0.35355338, %v604_v55  ;;  %v715_v0 = vmul.f32 0.35355338, %v655_v56  ;;  %v2909_v1 = vpop.f32.mrb[11].mxu0  ;;  %v2915_v2 = vpop.f32.mrb[19].mxu1  ;;  %v720_v3 = vadd.f32 %v712_v52, %v3844_v50  ;;  %v722_v15 = vadd.f32 %v714_v4, %v3863_v8 }
 0x444   :  { %v733_v5 = vsel %vm726_vm3, %v720_v3, -inf  ;;  %v723_v6 = vadd.f32 %v715_v0, %v3849_v57  ;;  %v721_v7 = vadd.f32 %v713_v62, %v3854_v58  ;;  %v739_v21 = vsel %vm726_vm3, %v722_v15, -inf }
 0x445   :  { %734 = vmax.xlane.f32.xlu0 %v733_v5 }
 0x446   :  { %v742_v9 = vsel %vm726_vm3, %v723_v6, -inf  ;;  %v736_v14 = vsel %vm726_vm3, %v721_v7, -inf }
 0x447   :  { %v703_v11 = vpop.f32.mrb[12].mxu0  ;;  %743 = vmax.xlane.f32.xlu1 %v742_v9 }
 0x448   :  { %v716_v12 = vmul.f32 0.35355338, %v703_v11  ;;  %v2920_v13 = vpop.f32.mrb[13].mxu0 }
 0x449   :  { %v706_v16 = vpop.f32.mrb[14].mxu0  ;;  %737 = vmax.xlane.f32.xlu0 %v736_v14 }
 0x44a   :  { %v717_v19 = vmul.f32 0.35355338, %v706_v16  ;;  %v2921_v20 = vpop.f32.mrb[15].mxu0  ;;  %v724_v23 = vadd.f32 %v716_v12, %v3876_v18 }
 0x44c   :  { %v3880_v22 = vadd.f32 %v717_v19, %v3871_v17  ;;  %v745_v25 = vsel %vm726_vm3, %v724_v23, -inf }
 0x44d   :  { %740 = vmax.xlane.f32.xlu0 %v739_v21 }
 0x44e   :  { %v748_v24 = vsel %vm726_vm3, %v3880_v22, -inf }
 0x44f   :  { %749 = vmax.xlane.f32.xlu1 %v748_v24 }
 0x451   :  { %746 = vmax.xlane.f32.xlu0 %v745_v25 }
 0x45f   :  { %v729_v26 = vpop.xlane.xlu0 %728 }
 0x460   :  { %v751_v27 = vsub.f32 %v718_v44, %v729_v26 }
 0x461   :  { %v732_v28 = vpop.xlane.xlu1 %731 }
 0x462   :  { %v759_v29 = vmul.f32 1.442695, %v751_v27  ;;  %v752_v30 = vsub.f32 %v719_v46, %v732_v28 }
 0x464   :  { %3205 = vpow2.f32 %v759_v29  ;;  %v761_v31 = vmul.f32 1.442695, %v752_v30 }
 0x466   :  { %3207 = vpow2.f32 %v761_v31 }
 0x46e   :  { %v3206_v32 = vpop.eup %3205 }
 0x46f   :  { %v775_v34 = vsel %vm726_vm3, %v3206_v32, 0.0 }
 0x470   :  { %v3208_v35 = vpop.eup %3207  ;;  %776 = vadd.xlane.f32.xlu0 %v775_v34 }
 0x471   :  { %v778_v36 = vsel %vm726_vm3, %v3208_v35, 0.0 }
 0x472   :  { %779 = vadd.xlane.f32.xlu1 %v778_v36 }
 0x4d2   :  { %v735_v40 = vpop.xlane.xlu0 %734 }
 0x4d3   :  { %v753_v42 = vsub.f32 %v720_v3, %v735_v40 }
 0x4d4   :  { %v744_v45 = vpop.xlane.xlu1 %743 }
 0x4d5   :  { %v763_v47 = vmul.f32 1.442695, %v753_v42  ;;  %v756_v48 = vsub.f32 %v723_v6, %v744_v45 }
 0x4d6   :  { %v738_v44 = vpop.xlane.xlu0 %737 }
 0x4d7   :  { %3209 = vpow2.f32 %v763_v47  ;;  %v754_v49 = vsub.f32 %v721_v7, %v738_v44  ;;  %v769_v46 = vmul.f32 1.442695, %v756_v48 }
 0x4d9   :  { %v765_v52 = vmul.f32 1.442695, %v754_v49 }
 0x4da   :  { %v741_v53 = vpop.xlane.xlu0 %740 }
 0x4db   :  { %3211 = vpow2.f32 %v765_v52  ;;  %v755_v54 = vsub.f32 %v722_v15, %v741_v53 }
 0x4dc   :  { %3213 = vpow2.f32 %v769_v46  ;;  %v750_v13 = vpop.xlane.xlu1 %749 }
 0x4dd   :  { %v767_v55 = vmul.f32 1.442695, %v755_v54  ;;  %v758_v20 = vsub.f32 %v3880_v22, %v750_v13 }
 0x4de   :  { %v747_v56 = vpop.xlane.xlu0 %746 }
 0x4df   :  { %3215 = vpow2.f32 %v767_v55  ;;  %v757_v62 = vsub.f32 %v724_v23, %v747_v56  ;;  %v773_v25 = vmul.f32 1.442695, %v758_v20 }
 0x4e1   :  { %v3210_v0 = vpop.eup %3209  ;;  %v771_v1 = vmul.f32 1.442695, %v757_v62 }
 0x4e2   :  { %v781_v2 = vsel %vm726_vm3, %v3210_v0, 0.0 }
 0x4e3   :  { %3217 = vpow2.f32 %v771_v1  ;;  %782 = vadd.xlane.f32.xlu0 %v781_v2 }
 0x4e5   :  { %v3212_v3 = vpop.eup %3211 }
 0x4e6   :  { %v784_v4 = vsel %vm726_vm3, %v3212_v3, 0.0  ;;  %v3214_v5 = vpop.eup %3213 }
 0x4e7   :  { %785 = vadd.xlane.f32.xlu1 %v784_v4  ;;  %v790_v9 = vsel %vm726_vm3, %v3214_v5, 0.0  ;;  %v3169_v4 = vld [vmem:[%s4236_s6] sm:$0xff]  }
 0x4e9   :  { %v3216_v6 = vpop.eup %3215 }
 0x4ea   :  { %v787_v7 = vsel %vm726_vm3, %v3216_v6, 0.0 }
 0x4eb   :  { %788 = vadd.xlane.f32.xlu0 %v787_v7  ;;  %791 = vadd.xlane.f32.xlu1 %v790_v9 }
 0x4ed   :  { %v3218_v11 = vpop.eup %3217 }
 0x4ee   :  { %v793_v12 = vsel %vm726_vm3, %v3218_v11, 0.0 }
 0x4ef   :  { %794 = vadd.xlane.f32.xlu0 %v793_v12 }
 0x4fc   :  { %911 = vrot.lane.b32.xlu1 %v3763_v51, %s3468_s14 }
 0x4fd   :  { %v777_v14 = vpop.xlane.xlu0 %776 }
 0x4fe   :  { %3219 = vrcp.f32 %v777_v14 }
 0x4ff   :  { %v780_v15 = vpop.xlane.xlu1 %779 }
 0x500   :  { %3221 = vrcp.f32 %v780_v15 }
 0x501   :  { %3223 = vpow2.f32 %v773_v25 }
 0x505   :  { %863 = vrot.lane.b32.xlu0 %v3763_v51, %s3467_s13 }
 0x508   :  { %v3220_v16 = vpop.eup %3219 }
 0x509   :  { %v807_v21 = vmul.f32 %v3220_v16, %v3206_v32 }
 0x50a   :  { %v3222_v19 = vpop.eup %3221 }
 0x50b   :  { %v808_v23 = vmul.f32 %v3222_v19, %v3208_v35  ;;  %v3224_v26 = vpop.eup %3223  ;;  %v3170_v19 = vld [vmem:[%s4236_s6 + $0x8] sm:$0xff]  }
 0x50c   :  { %v796_v27 = vsel %vm726_vm3, %v3224_v26, 0.0 }
 0x50d   :  { %v815_v24 = vpack.c.bf16 %v808_v23, %v807_v21 }
 0x50f   :  { %2925 = vmatmul.mubr.msk.bf16.vlgmr.msra.gmra.mrb[20].mxu1 %vm726_vm3, %v815_v24 }
 0x510   :  { %2936 = vmatprep.mubr.msk.bf16.mxu1 %vm3466_vm1, %v3465_v10 }
 0x520   :  { %797 = vadd.xlane.f32.xlu1 %v796_v27 }
 0x531   :  { %959 = vrot.lane.b32.xlu1 %v3763_v51, %s3469_s23 }
 0x570   :  { %v783_v28 = vpop.xlane.xlu0 %782 }
 0x571   :  { %3225 = vrcp.f32 %v783_v28 }
 0x574   :  { %v786_v22 = vpop.xlane.xlu1 %785 }
 0x575   :  { %3227 = vrcp.f32 %v786_v22 }
 0x578   :  { %v789_v29 = vpop.xlane.xlu0 %788  ;;  %v792_v30 = vpop.xlane.xlu1 %791 }
 0x579   :  { %3229 = vrcp.f32 %v789_v29 }
 0x57a   :  { %3231 = vrcp.f32 %v792_v30 }
 0x57b   :  { %v3226_v34 = vpop.eup %3225 }
 0x57c   :  { %v795_v31 = vpop.xlane.xlu0 %794  ;;  %v912_v32 = vpop.permute.xlu1 %911  ;;  %v809_v36 = vmul.f32 %v3226_v34, %v3210_v0 }
 0x57d   :  { %2935 = vmatpush3.bf16.msra.mxu1 %v912_v32  ;;  %3233 = vrcp.f32 %v795_v31 }
 0x57e   :  { %2946 = vmatprep.subr.bf16.mxu1 %v3465_v10 }
 0x57f   :  { %v3228_v35 = vpop.eup %3227 }
 0x580   :  { %v810_v40 = vmul.f32 %v3228_v35, %v3212_v3  ;;  %v864_v42 = vpop.permute.xlu0 %863 }
 0x581   :  { %2929 = vmatpush3.bf16.msra.mxu0 %v864_v42 }
 0x582   :  { %v861_v51 = vpack.c.bf16 %v810_v40, %v809_v36  ;;  %2940 = vmatprep.subr.bf16.mxu0 %v3465_v10 }
 0x583   :  { %v3230_v45 = vpop.eup %3229 }
 0x584   :  { %v3232_v47 = vpop.eup %3231  ;;  %v811_v48 = vmul.f32 %v3230_v45, %v3216_v6  ;;  %2931 = vmatmul.mubr.msk.bf16.vlgmr.msra.gmra.mrb[16].mxu0 %vm726_vm3, %v861_v51 }
 0x585   :  { %v812_v44 = vmul.f32 %v3232_v47, %v3214_v5  ;;  %2942 = vmatprep.mubr.msk.bf16.mxu0 %vm3466_vm1, %v3465_v10 }
 0x587   :  { %v910_v49 = vpack.c.bf16 %v812_v44, %v811_v48  ;;  %v3234_v53 = vpop.eup %3233 }
 0x588   :  { %v813_v55 = vmul.f32 %v3234_v53, %v3218_v11 }
 0x589   :  { %2937 = vmatmul.mubr.msk.bf16.vlgmr.msra.gmra.mrb[24].mxu1 %vm726_vm3, %v910_v49 }
 0x58a   :  { %2950 = vmatprep.mubr.msk.bf16.mxu1 %vm3466_vm1, %v3465_v10  ;;  %2947 = vmatpush3.bf16.msra.mxu1 %v3169_v4 }
 0x58b   :  { %2948 = vmatprep.subr.bf16.mxu1 %v3465_v10 }
 0x58e   :  { %2949 = vmatpush3.bf16.msra.mxu1 %v3170_v19 }
 0x58f   :  { %2962 = vmatprep.subr.bf16.mxu1 %v3465_v10 }
 0x5ad   :  { %v798_v46 = vpop.xlane.xlu1 %797 }
 0x5ae   :  { %3235 = vrcp.f32 %v798_v46 }
 0x5b1   :  { %v960_v52 = vpop.permute.xlu1 %959 }
 0x5b2   :  { %2941 = vmatpush3.bf16.msra.mxu0 %v960_v52 }
 0x5b3   :  { %2954 = vmatprep.subr.bf16.mxu0 %v3465_v10 }
 0x5b8   :  { %v3236_v54 = vpop.eup %3235 }
 0x5b9   :  { %v814_v56 = vmul.f32 %v3236_v54, %v3224_v26 }
 0x5bb   :  { %v958_v62 = vpack.c.bf16 %v814_v56, %v813_v55 }
 0x5bd   :  { %2943 = vmatmul.mubr.msk.bf16.vlgmr.msra.gmra.mrb[20].mxu0 %vm726_vm3, %v958_v62 }
 0x5be   :  { %2958 = vmatprep.mubr.msk.bf16.mxu0 %vm3466_vm1, %v3465_v10 }
 0x5e2   :  { %v854_v0 = vpop.f32.mrb[20].mxu1 }
 0x5e3   :  { %v2926_v1 = vpop.f32.mrb[21].mxu1 }
 0x5e4   :  { %v857_v2 = vpop.f32.mrb[22].mxu1 }
 0x5e5   :  { %v2927_v3 = vpop.f32.mrb[23].mxu1 }
 0x5e6   :  { %v3174_v3 = vld [vmem:[%s4241_s11 + $0x8] sm:$0xff]  }
 0x657   :  { %v903_v5 = vpop.f32.mrb[16].mxu0 }
 0x658   :  { %v2932_v6 = vpop.f32.mrb[17].mxu0 }
 0x659   :  { %v906_v7 = vpop.f32.mrb[18].mxu0 }
 0x65a   :  { %v3131_v9 = vpack.i.bf16 %v906_v7, %v903_v5  ;;  %v2933_v11 = vpop.f32.mrb[19].mxu0 }
 0x65c   :  { %v951_v12 = vpop.f32.mrb[24].mxu1  ;;  %3132 = vrot.lane.b32.xlu1 %v3131_v9, %s3470_s4 }
 0x65d   :  { %v2938_v13 = vpop.f32.mrb[25].mxu1 }
 0x65e   :  { %v954_v14 = vpop.f32.mrb[26].mxu1 }
 0x65f   :  { %v3136_v15 = vpack.i.bf16 %v954_v14, %v951_v12  ;;  %v2939_v16 = vpop.f32.mrb[27].mxu1 }
 0x661   :  { %3137 = vrot.lane.b32.xlu0 %v3136_v15, %s3459_s0 }
 0x690   :  { %v999_v20 = vpop.f32.mrb[20].mxu0 }
 0x691   :  { %v2944_v21 = vpop.f32.mrb[21].mxu0 }
 0x692   :  { %v1002_v23 = vpop.f32.mrb[22].mxu0 }
 0x693   :  { %v3141_v24 = vpack.i.bf16 %v1002_v23, %v999_v20  ;;  %v2945_v25 = vpop.f32.mrb[23].mxu0 }
 0x695   :  { %3142 = vrot.lane.b32.xlu1 %v3141_v24, %s3471_s8 }
 0x6ce   :  { %v3133_v26 = vpop.permute.xlu1 %3132 }
 0x6cf   :  { %v3135_v28 = vunpack.i.h.bf16 %v3133_v26  ;;  %v3134_v22 = vunpack.i.l.bf16 %v3133_v26  ;;  %v2668_v26 = vld [vmem:[#allocation7] ss:$0 sm:$0xff] }
 0x6d1   :  { %v1030_v32 = vsel %vm507_vm2, %v854_v0, %v3134_v22  ;;  %v1031_v34 = vsel %vm507_vm2, %v857_v2, %v3135_v28  ;;  %v3173_v2 = vld [vmem:[%s4241_s11] sm:$0xff]  }
 0x6d3   :  { %v3138_v27 = vpop.permute.xlu0 %3137 }
 0x6d4   :  { %v3140_v29 = vunpack.i.h.bf16 %v3138_v27  ;;  %v3139_v30 = vunpack.i.l.bf16 %v3138_v27 }
 0x6d6   :  { %v1033_v40 = vsel %vm726_vm3, %v1031_v34, %v3140_v29  ;;  %v1032_v42 = vsel %vm726_vm3, %v1030_v32, %v3139_v30  ;;  %v2669_v30 = vld [vmem:[#allocation8] ss:$0 sm:$0xff] }
 0x707   :  { %v3143_v31 = vpop.permute.xlu1 %3142 }
 0x708   :  { %v3145_v35 = vunpack.i.h.bf16 %v3143_v31  ;;  %v3144_v36 = vunpack.i.l.bf16 %v3143_v31 }
 0x70a   :  { %v1035_v51 = vsel %vm1034_vm4, %v1032_v42, %v3144_v36  ;;  %v1036_v45 = vsel %vm1034_vm4, %v1033_v40, %v3145_v35  ;;  %v3175_v36 = vld [vmem:[%s4241_s11 + $0x10] sm:$0xff]   ;;  %v3176_v40 = vld [vmem:[%s4241_s11 + $0x18] sm:$0xff]   ;;  %v3177_v42 = vld [vmem:[%s4241_s11 + $0x20] sm:$0xff]  }
 0x70b   :  { %v1037_v47 = vpack.c.bf16 %v1036_v45, %v1035_v51  ;;  %v3178_v51 = vld [vmem:[%s4241_s11 + $0x28] sm:$0xff]   ;;  %v3179_v45 = vld [vmem:[%s4241_s11 + $0x30] sm:$0xff]  }
 0x70d   :  { %2951 = vmatmul.mubr.msk.bf16.vlgmr.msra.gmra.mrb[28].mxu1 %vm169_vm0, %v1037_v47  ;;  %v3180_v47 = vld [vmem:[%s4241_s11 + $0x38] sm:$0xff]  }
 0x70e   :  { %2978 = vmatprep.mubr.msk.bf16.mxu1 %vm3466_vm1, %v3465_v10  ;;  %2963 = vmatpush3.bf16.msra.mxu1 %v3173_v2 }
 0x70f   :  { %2964 = vmatprep.subr.bf16.mxu1 %v3465_v10 }
 0x712   :  { %2965 = vmatpush3.bf16.msra.mxu1 %v3174_v3 }
 0x713   :  { %2966 = vmatprep.subr.bf16.mxu1 %v3465_v10 }
 0x716   :  { %2967 = vmatpush3.bf16.msra.mxu1 %v3175_v36 }
 0x717   :  { %2968 = vmatprep.subr.bf16.mxu1 %v3465_v10 }
 0x71a   :  { %2969 = vmatpush3.bf16.msra.mxu1 %v3176_v40 }
 0x71b   :  { %2970 = vmatprep.subr.bf16.mxu1 %v3465_v10 }
 0x71e   :  { %2971 = vmatpush3.bf16.msra.mxu1 %v3177_v42 }
 0x71f   :  { %2972 = vmatprep.subr.bf16.mxu1 %v3465_v10 }
 0x722   :  { %2973 = vmatpush3.bf16.msra.mxu1 %v3178_v51 }
 0x723   :  { %2974 = vmatprep.subr.bf16.mxu1 %v3465_v10 }
 0x726   :  { %2975 = vmatpush3.bf16.msra.mxu1 %v3179_v45 }
 0x727   :  { %2976 = vmatprep.subr.bf16.mxu1 %v3465_v10 }
 0x72a   :  { %2977 = vmatpush3.bf16.msra.mxu1 %v3180_v47 }
 0x72b   :  { %3014 = vmatprep.subr.bf16.mxu1 %v3465_v10 }
 0x7e0   :  { %v1091_v48 = vpop.f32.mrb[28].mxu1 }
 0x7e1   :  { %v1098_v44 = vadd.f32 %v1091_v48, %v3722_v37  ;;  %v2952_v49 = vpop.f32.mrb[29].mxu1  ;;  %v3171_v37 = vld [vmem:[%s4239_s9] sm:$0xff]   ;;  %v2670_v48 = vld [vmem:[#allocation10] ss:$0 sm:$0xff] }
 0x7e2   :  { %v1094_v46 = vpop.f32.mrb[30].mxu1  ;;  %2955 = vmatpush3.bf16.msra.mxu0 %v3171_v37 }
 0x7e3   :  { %v1099_v52 = vadd.f32 %v1094_v46, %v3724_v38  ;;  %v2953_v53 = vpop.f32.mrb[31].mxu1  ;;  %v1102_v54 = vsel %vm169_vm0, %v1098_v44, 0.0  ;;  %v1108_v55 = vmul.f32 %v1098_v44, %v1098_v44  ;;  %v3172_v38 = vld [vmem:[%s4239_s9 + $0x8] sm:$0xff]   ;;  %2956 = vmatprep.subr.bf16.mxu0 %v3465_v10 }
 0x7e4   :  { %1103 = vadd.xlane.f32.xlu0 %v1102_v54 }
 0x7e5   :  { %v1105_v56 = vsel %vm169_vm0, %v1099_v52, 0.0  ;;  %v1110_v62 = vsel %vm169_vm0, %v1108_v55, 0.0  ;;  %v1109_v0 = vmul.f32 %v1099_v52, %v1099_v52 }
 0x7e6   :  { %1106 = vadd.xlane.f32.xlu1 %v1105_v56  ;;  %2957 = vmatpush3.bf16.msra.mxu0 %v3172_v38 }
 0x7e7   :  { %v1113_v1 = vsel %vm169_vm0, %v1109_v0, 0.0  ;;  %2982 = vmatprep.subr.bf16.mxu0 %v3465_v10 }
 0x7e8   :  { %1111 = vadd.xlane.f32.xlu0 %v1110_v62 }
 0x7ec   :  { %1114 = vadd.xlane.f32.xlu0 %v1113_v1 }
 0x871   :  { %v1104_v4 = vpop.xlane.xlu0 %1103 }
 0x872   :  { %v1116_v5 = vmul.f32 0.03125, %v1104_v4 }
 0x873   :  { %v1107_v6 = vpop.xlane.xlu1 %1106 }
 0x874   :  { %v1120_v9 = vmul.f32 %v1116_v5, %v1116_v5  ;;  %v1117_v11 = vmul.f32 0.03125, %v1107_v6  ;;  %v1124_v23 = vsub.f32 %v1098_v44, %v1116_v5  ;;  %v2674_v6 = vld [vmem:[#allocation11] ss:$0 sm:$0xff] }
 0x875   :  { %v1112_v7 = vpop.xlane.xlu0 %1111 }
 0x876   :  { %v1118_v12 = vmul.f32 0.03125, %v1112_v7  ;;  %v1121_v15 = vmul.f32 %v1117_v11, %v1117_v11  ;;  %v1125_v27 = vsub.f32 %v1099_v52, %v1117_v11 }
 0x878   :  { %v1122_v13 = vsub.f32 %v1118_v12, %v1120_v9 }
 0x879   :  { %v1115_v14 = vpop.xlane.xlu0 %1114 }
 0x87a   :  { %v1126_v16 = vadd.f32 1e-05, %v1122_v13  ;;  %v1119_v19 = vmul.f32 0.03125, %v1115_v14 }
 0x87c   :  { %3237 = vrsqrt.f32 %v1126_v16  ;;  %v1123_v20 = vsub.f32 %v1119_v19, %v1121_v15 }
 0x87e   :  { %v1127_v21 = vadd.f32 1e-05, %v1123_v20 }
 0x880   :  { %3239 = vrsqrt.f32 %v1127_v21 }
 0x886   :  { %v3238_v24 = vpop.eup %3237 }
 0x887   :  { %v1130_v25 = vmul.f32 %v3238_v24, %v1124_v23 }
 0x889   :  { %v1138_v29 = vmul.f32 %v2668_v26, %v1130_v25 }
 0x88a   :  { %v3240_v28 = vpop.eup %3239 }
 0x88b   :  { %v1131_v22 = vmul.f32 %v3240_v28, %v1125_v27  ;;  %v1146_v32 = vadd.f32 %v2669_v30, %v1138_v29  ;;  %v3182_v27 = vld [vmem:[%s4267_s24 + $0x18] sm:$0xff]  }
 0x88d   :  { %v1139_v31 = vmul.f32 %v2668_v26, %v1131_v22  ;;  %v3181_v26 = vld [vmem:[%s4267_s24 + $0x10] sm:$0xff]  }
 0x88f   :  { %v1147_v34 = vadd.f32 %v2669_v30, %v1139_v31 }
 0x891   :  { %v1148_v35 = vpack.c.bf16 %v1147_v34, %v1146_v32 }
 0x893   :  { %2959 = vmatmul.mubr.msk.bf16.vlgmr.msra.gmra.mrb[24].mxu0 %vm169_vm0, %v1148_v35 }
 0x894   :  { %2986 = vmatprep.mubr.msk.bf16.mxu0 %vm3466_vm1, %v3465_v10  ;;  %2983 = vmatpush3.bf16.msra.mxu0 %v3181_v26 }
 0x895   :  { %2984 = vmatprep.subr.bf16.mxu0 %v3465_v10 }
 0x898   :  { %2985 = vmatpush3.bf16.msra.mxu0 %v3182_v27 }
 0x899   :  { %2990 = vmatprep.subr.bf16.mxu0 %v3465_v10 }
 0x966   :  { %v1209_v44 = vpop.f32.mrb[24].mxu0 }
 0x967   :  { %v1210_v49 = vadd.f32 %v2670_v48, %v1209_v44  ;;  %v2960_v46 = vpop.f32.mrb[25].mxu0 }
 0x968   :  { %v1212_v52 = vpop.f32.mrb[26].mxu0 }
 0x969   :  { %v1218_v53 = vmul.f32 0.70710677, %v1210_v49  ;;  %v1213_v54 = vadd.f32 %v2670_v48, %v1212_v52  ;;  %v2961_v55 = vpop.f32.mrb[27].mxu0  ;;  %v1216_v37 = vmul.f32 0.5, %v1210_v49  ;;  %v2683_v49 = vld [vmem:[#allocation2 + $0x1] ss:$0 sm:$0xff] }
 0x96b   :  { %3241 = verf.f32 %v1218_v53  ;;  %v1219_v56 = vmul.f32 0.70710677, %v1213_v54  ;;  %v1217_v38 = vmul.f32 0.5, %v1213_v54 }
 0x96d   :  { %3243 = verf.f32 %v1219_v56  ;;  %v2684_v56 = vld [vmem:[#allocation5 + $0x1] ss:$0 sm:$0xff] }
 0x975   :  { %v3242_v62 = vpop.eup %3241 }
 0x976   :  { %v1222_v0 = vadd.f32 1.0, %v3242_v62 }
 0x977   :  { %v3244_v1 = vpop.eup %3243 }
 0x978   :  { %v1223_v2 = vadd.f32 1.0, %v3244_v1  ;;  %v1224_v3 = vmul.f32 %v1222_v0, %v1216_v37  ;;  %v3183_v37 = vld [vmem:[%s4268_s3 + $0x10] sm:$0xff]  }
 0x97a   :  { %v1225_v4 = vmul.f32 %v1223_v2, %v1217_v38  ;;  %v3184_v2 = vld [vmem:[%s4268_s3 + $0x18] sm:$0xff]  }
 0x97c   :  { %v1226_v5 = vpack.c.bf16 %v1225_v4, %v1224_v3  ;;  %v3185_v3 = vld [vmem:[%s4235_s5 + $0x10] sm:$0xff]   ;;  %v3186_v4 = vld [vmem:[%s4235_s5 + $0x18] sm:$0xff]  }
 0x97e   :  { %2979 = vmatmul.mubr.bf16.vlgmr.msra.gmra.mrb[32].mxu1 %v1226_v5 }
 0x97f   :  { %3015 = vmatpush3.bf16.msra.mxu1 %v3736_v41  ;;  %3018 = vmatprep.mubr.msk.bf16.mxu1 %vm3466_vm1, %v3465_v10 }
 0x980   :  { %3016 = vmatprep.subr.bf16.mxu1 %v3465_v10 }
 0x983   :  { %3017 = vmatpush3.bf16.msra.mxu1 %v3757_v43 }
 0x984   :  { %3028 = vmatprep.subr.bf16.mxu1 %v3465_v10 }
 0xa51   :  { %v1332_v7 = vpop.f32.mrb[32].mxu1 }
 0xa52   :  { %v1333_v9 = vadd.f32 %v2674_v6, %v1332_v7  ;;  %v2980_v11 = vpop.f32.mrb[33].mxu1 }
 0xa53   :  { %v1335_v12 = vpop.f32.mrb[34].mxu1 }
 0xa54   :  { %v1339_v13 = vadd.f32 %v1333_v9, %v1146_v32  ;;  %v1336_v14 = vadd.f32 %v2674_v6, %v1335_v12  ;;  %v2981_v15 = vpop.f32.mrb[35].mxu1 }
 0xa56   :  { %v1340_v16 = vadd.f32 %v1336_v14, %v1147_v34  ;;  %v1345_v19 = vsel %vm169_vm0, %v1339_v13, 0.0  ;;  %v1351_v20 = vmul.f32 %v1339_v13, %v1339_v13 }
 0xa57   :  { %1346 = vadd.xlane.f32.xlu0 %v1345_v19 }
 0xa58   :  { %v1348_v21 = vsel %vm169_vm0, %v1340_v16, 0.0  ;;  %v1352_v23 = vmul.f32 %v1340_v16, %v1340_v16  ;;  %v1353_v24 = vsel %vm169_vm0, %v1351_v20, 0.0 }
 0xa59   :  { %1349 = vadd.xlane.f32.xlu1 %v1348_v21 }
 0xa5a   :  { %v1356_v25 = vsel %vm169_vm0, %v1352_v23, 0.0 }
 0xa5b   :  { %1354 = vadd.xlane.f32.xlu0 %v1353_v24 }
 0xa5d   :  { %1357 = vadd.xlane.f32.xlu1 %v1356_v25 }
 0xae4   :  { %v1347_v28 = vpop.xlane.xlu0 %1346 }
 0xae5   :  { %v1359_v22 = vmul.f32 0.03125, %v1347_v28 }
 0xae6   :  { %v1350_v29 = vpop.xlane.xlu1 %1349 }
 0xae7   :  { %v1360_v30 = vmul.f32 0.03125, %v1350_v29  ;;  %v1363_v32 = vmul.f32 %v1359_v22, %v1359_v22  ;;  %v1367_v48 = vsub.f32 %v1339_v13, %v1359_v22 }
 0xae8   :  { %v1355_v31 = vpop.xlane.xlu0 %1354 }
 0xae9   :  { %v1361_v34 = vmul.f32 0.03125, %v1355_v31  ;;  %v1364_v36 = vmul.f32 %v1360_v30, %v1360_v30  ;;  %v1368_v46 = vsub.f32 %v1340_v16, %v1360_v30 }
 0xaea   :  { %v1358_v35 = vpop.xlane.xlu1 %1357 }
 0xaeb   :  { %v1365_v40 = vsub.f32 %v1361_v34, %v1363_v32  ;;  %v1362_v42 = vmul.f32 0.03125, %v1358_v35 }
 0xaed   :  { %v1369_v51 = vadd.f32 1e-05, %v1365_v40  ;;  %v1366_v45 = vsub.f32 %v1362_v42, %v1364_v36 }
 0xaef   :  { %3245 = vrsqrt.f32 %v1369_v51  ;;  %v1370_v47 = vadd.f32 1e-05, %v1366_v45 }
 0xaf1   :  { %3247 = vrsqrt.f32 %v1370_v47 }
 0xaf9   :  { %v3246_v44 = vpop.eup %3245 }
 0xafa   :  { %v1373_v52 = vmul.f32 %v3246_v44, %v1367_v48 }
 0xafb   :  { %v3248_v53 = vpop.eup %3247 }
 0xafc   :  { %v1374_v54 = vmul.f32 %v3248_v53, %v1368_v46  ;;  %v1381_v55 = vmul.f32 %v2683_v49, %v1373_v52 }
 0xafe   :  { %v1382_v62 = vmul.f32 %v2683_v49, %v1374_v54  ;;  %v4003_v0 = vadd.f32 %v2684_v56, %v1381_v55 }
 0xb00   :  { %v4005_v1 = vadd.f32 %v2684_v56, %v1382_v62 }
 0xb02   :  { %v1391_v38 = vpack.c.bf16 %v4005_v1, %v4003_v0 }
 0xb04   :  { %2987 = vmatmul.mubr.msk.bf16.vlgmr.msra.gmra.mrb[28].mxu0 %vm169_vm0, %v1391_v38 }
 0xb05   :  { %2991 = vmatpush3.bf16.msra.mxu0 %v3183_v37  ;;  %2994 = vmatprep.mubr.msk.bf16.mxu0 %vm3466_vm1, %v3465_v10 }
 0xb06   :  { %2992 = vmatprep.subr.bf16.mxu0 %v3465_v10 }
 0xb09   :  { %2993 = vmatpush3.bf16.msra.mxu0 %v3184_v2 }
 0xb0a   :  { %2998 = vmatprep.subr.bf16.mxu0 %v3465_v10 }
 0xb0c   :  { %2995 = vmatmul.mubr.msk.bf16.vlgmr.msra.gmra.mrb[32].mxu0 %vm169_vm0, %v1391_v38 }
 0xb0d   :  { %2999 = vmatpush3.bf16.msra.mxu0 %v3185_v3  ;;  %3002 = vmatprep.mubr.msk.bf16.mxu0 %vm3466_vm1, %v3465_v10 }
 0xb0e   :  { %3000 = vmatprep.subr.bf16.mxu0 %v3465_v10 }
 0xb11   :  { %3001 = vmatpush3.bf16.msra.mxu0 %v3186_v4 }
 0xb12   :  { %3006 = vmatprep.subr.bf16.mxu0 %v3465_v10 }
 0xb14   :  { %3003 = vmatmul.mubr.msk.bf16.vlgmr.msra.gmra.mrb[36].mxu0 %vm169_vm0, %v1391_v38 }
 0xb15   :  { %3007 = vmatpush3.bf16.msra.mxu0 %v3736_v41  ;;  %3010 = vmatprep.mubr.msk.bf16.mxu0 %vm3466_vm1, %v3465_v10 }
 0xb16   :  { %3008 = vmatprep.subr.bf16.mxu0 %v3465_v10 }
 0xb19   :  { %3009 = vmatpush3.bf16.msra.mxu0 %v3757_v43 }
 0xb1a   :  { %3022 = vmatprep.subr.bf16.mxu0 %v3465_v10 }
 0xbd7   :  { %v1446_v5 = vpop.f32.mrb[28].mxu0 }
 0xbd8   :  { %v2988_v6 = vpop.f32.mrb[29].mxu0  ;;  %v1569_v24 = vmul.f32 %v1446_v5, %v3774_v59 }
 0xbd9   :  { %v1449_v7 = vpop.f32.mrb[30].mxu0 }
 0xbda   :  { %v1571_v9 = vpack.c.bf16 %v1449_v7, %v1446_v5  ;;  %v2989_v11 = vpop.f32.mrb[31].mxu0  ;;  %v1570_v28 = vmul.f32 %v1449_v7, %v3784_v61 }
 0xbdc   :  { %3011 = vmatmul.mubr.msk.bf16.vlgmr.msra.gmra.mrb[40].mxu0 %vm169_vm0, %v1571_v9 }
 0xbdd   :  { %3024 = vmatprep.mubr.msk.bf16.mxu0 %vm3466_vm1, %v3465_v10 }
 0xbdf   :  { %v1504_v41 = vpop.f32.mrb[32].mxu0 }
 0xbe0   :  { %v2996_v12 = vpop.f32.mrb[33].mxu0  ;;  %v1620_v35 = vmul.f32 %v1504_v41, %v3774_v59 }
 0xbe1   :  { %v1507_v13 = vpop.f32.mrb[34].mxu0 }
 0xbe2   :  { %v1622_v14 = vpack.c.bf16 %v1507_v13, %v1504_v41  ;;  %v2997_v15 = vpop.f32.mrb[35].mxu0  ;;  %v1621_v51 = vmul.f32 %v1507_v13, %v3784_v61 }
 0xbe4   :  { %3019 = vmatmul.mubr.msk.bf16.vlgmr.msra.gmra.mrb[36].mxu1 %vm169_vm0, %v1622_v14 }
 0xbe5   :  { %3030 = vmatprep.mubr.msk.bf16.mxu1 %vm3466_vm1, %v3465_v10 }
 0xbe7   :  { %v1562_v43 = vpop.f32.mrb[36].mxu0 }
 0xbe8   :  { %v3004_v16 = vpop.f32.mrb[37].mxu0 }
 0xbe9   :  { %v1565_v19 = vpop.f32.mrb[38].mxu0 }
 0xbea   :  { %v4044_v20 = vpack.c.bf16 %v1565_v19, %v1562_v43  ;;  %v3005_v21 = vpop.f32.mrb[39].mxu0 }
 0xcaf   :  { %v1609_v23 = vpop.f32.mrb[40].mxu0 }
 0xcb0   :  { %v1616_v25 = vmul.f32 %v1609_v23, %v3779_v60  ;;  %v3012_v26 = vpop.f32.mrb[41].mxu0 }
 0xcb1   :  { %v1612_v27 = vpop.f32.mrb[42].mxu0 }
 0xcb2   :  { %v1618_v22 = vadd.f32 %v1616_v25, %v1569_v24  ;;  %v1617_v29 = vmul.f32 %v1612_v27, %v3789_v63  ;;  %v3013_v30 = vpop.f32.mrb[43].mxu0 }
 0xcb4   :  { %v1619_v31 = vadd.f32 %v1617_v29, %v1570_v28 }
 0xcb6   :  { %v1671_v32 = vpack.c.bf16 %v1619_v31, %v1618_v22 }
 0xcb7   :  { %v1660_v34 = vpop.f32.mrb[36].mxu1 }
 0xcb8   :  { %v1667_v36 = vmul.f32 %v1660_v34, %v3779_v60  ;;  %1721 = vrot.lane.b32.xlu1 %v1671_v32, %s3467_s13  ;;  %v3020_v40 = vpop.f32.mrb[37].mxu1 }
 0xcb9   :  { %v1663_v42 = vpop.f32.mrb[38].mxu1 }
 0xcba   :  { %v1669_v45 = vadd.f32 %v1667_v36, %v1620_v35  ;;  %v1668_v47 = vmul.f32 %v1663_v42, %v3789_v63  ;;  %v3021_v48 = vpop.f32.mrb[39].mxu1 }
 0xcbc   :  { %v1670_v44 = vadd.f32 %v1668_v47, %v1621_v51 }
 0xcbe   :  { %v1672_v49 = vpack.c.bf16 %v1670_v44, %v1669_v45 }
 0xcc0   :  { %1775 = vrot.lane.b32.xlu1 %v1672_v49, %s3468_s14  ;;  %1724 = vrot.lane.b32.xlu0 %v1672_v49, %s3467_s13  ;;  %v1677_v59 = vsel %vm507_vm2, %v1672_v49, 0 }
 0xcc1   :  { %3023 = vmatpush3.bf16.xpose.msra.mxu0 %v1677_v59 }
 0xcc2   :  { %3034 = vmatprep.subr.bf16.mxu0 %v3465_v10 }
 0xcc4   :  { %1826 = vrot.lane.b32.xlu1 %v1672_v49, %s3469_s23  ;;  %1773 = vrot.lane.b32.xlu0 %v1671_v32, %s3468_s14 }
 0xcc8   :  { %1824 = vrot.lane.b32.xlu1 %v1671_v32, %s3469_s23  ;;  %3025 = vmatmul.mubr.msk.bf16.vlgmr.msra.gmra.mrb[44].mxu0 %vm507_vm2, %v1671_v32 }
 0xcc9   :  { %3036 = vmatprep.mubr.msk.bf16.mxu0 %vm3466_vm1, %v3465_v10 }
 0xd2a   :  { %v1722_v60 = vpop.permute.xlu1 %1721 }
 0xd32   :  { %v1776_v61 = vpop.permute.xlu1 %1775  ;;  %v1725_v63 = vpop.permute.xlu0 %1724 }
 0xd33   :  { %v1781_v46 = vsel %vm507_vm2, %v1776_v61, 0  ;;  %v1730_v52 = vsel %vm507_vm2, %v1725_v63, 0 }
 0xd34   :  { %3029 = vmatpush3.bf16.xpose.msra.mxu1 %v1730_v52  ;;  %3035 = vmatpush3.bf16.xpose.msra.mxu0 %v1781_v46 }
 0xd35   :  { %3040 = vmatprep.subr.bf16.mxu1 %v3465_v10  ;;  %3046 = vmatprep.subr.bf16.mxu0 %v3465_v10 }
 0xd36   :  { %v1827_v53 = vpop.permute.xlu1 %1826  ;;  %v1774_v54 = vpop.permute.xlu0 %1773 }
 0xd37   :  { %v1832_v55 = vsel %vm507_vm2, %v1827_v53, 0 }
 0xd3a   :  { %v1825_v56 = vpop.permute.xlu1 %1824 }
 0xd3b   :  { %3031 = vmatmul.mubr.msk.bf16.vlgmr.msra.gmra.mrb[40].mxu1 %vm507_vm2, %v1722_v60  ;;  %3037 = vmatmul.mubr.msk.bf16.vlgmr.msra.gmra.mrb[48].mxu0 %vm507_vm2, %v1774_v54 }
 0xd3c   :  { %3041 = vmatpush3.bf16.xpose.msra.mxu1 %v1832_v55  ;;  %3047 = vmatpush3.bf16.msra.mxu0 %v4044_v20 }
 0xd3d   :  { %3042 = vmatprep.mubr.msk.bf16.mxu1 %vm3466_vm1, %v3465_v10  ;;  %3048 = vmatprep.mubr.msk.bf16.mxu0 %vm3466_vm1, %v3465_v10 }
 0xd3e   :  { %3058 = vmatprep.subr.bf16.mxu0 %v3465_v10  ;;  %3052 = vmatprep.subr.bf16.mxu1 %v3465_v10 }
 0xd43   :  { %3043 = vmatmul.mubr.msk.bf16.vlgmr.msra.gmra.mrb[44].mxu1 %vm507_vm2, %v1825_v56 }
 0xd44   :  { %3054 = vmatprep.mubr.msk.bf16.mxu1 %vm3466_vm1, %v3465_v10 }
 0xd9b   :  { %v1713_v62 = vpop.f32.mrb[44].mxu0 }
 0xd9c   :  { %v1875_v37 = vmul.f32 0.35355338, %v1713_v62  ;;  %v3026_v38 = vpop.f32.mrb[45].mxu0 }
 0xd9d   :  { %v1716_v2 = vpop.f32.mrb[46].mxu0 }
 0xd9e   :  { %v1876_v3 = vmul.f32 0.35355338, %v1716_v2  ;;  %v3027_v4 = vpop.f32.mrb[47].mxu0  ;;  %v1883_v5 = vadd.f32 %v1875_v37, %v3830_v33 }
 0xda0   :  { %v1891_v6 = vsel %vm726_vm3, %v1883_v5, -inf  ;;  %v1884_v7 = vadd.f32 %v1876_v3, %v3835_v39 }
 0xda1   :  { %1892 = vmax.xlane.f32.xlu0 %v1891_v6 }
 0xda2   :  { %v1894_v9 = vsel %vm726_vm3, %v1884_v7, -inf }
 0xda3   :  { %1895 = vmax.xlane.f32.xlu1 %v1894_v9 }
 0xe0e   :  { %v1766_v11 = vpop.f32.mrb[40].mxu1  ;;  %v1817_v41 = vpop.f32.mrb[48].mxu0 }
 0xe0f   :  { %v1877_v12 = vmul.f32 0.35355338, %v1766_v11  ;;  %v3032_v13 = vpop.f32.mrb[41].mxu1  ;;  %v3038_v14 = vpop.f32.mrb[49].mxu0  ;;  %v1879_v24 = vmul.f32 0.35355338, %v1817_v41 }
 0xe10   :  { %v1769_v15 = vpop.f32.mrb[42].mxu1  ;;  %v1820_v43 = vpop.f32.mrb[50].mxu0 }
 0xe11   :  { %v1878_v16 = vmul.f32 0.35355338, %v1769_v15  ;;  %v1880_v19 = vmul.f32 0.35355338, %v1820_v43  ;;  %v3033_v21 = vpop.f32.mrb[43].mxu1  ;;  %v3039_v23 = vpop.f32.mrb[51].mxu0  ;;  %v1885_v33 = vadd.f32 %v1877_v12, %v3844_v50  ;;  %v1887_v31 = vadd.f32 %v1879_v24, %v3863_v8 }
 0xe13   :  { %v1897_v39 = vsel %vm726_vm3, %v1885_v33, -inf  ;;  %v1888_v25 = vadd.f32 %v1880_v19, %v3849_v57  ;;  %v1886_v26 = vadd.f32 %v1878_v16, %v3854_v58  ;;  %v1903_v35 = vsel %vm726_vm3, %v1887_v31, -inf }
 0xe14   :  { %1898 = vmax.xlane.f32.xlu0 %v1897_v39 }
 0xe15   :  { %v1906_v27 = vsel %vm726_vm3, %v1888_v25, -inf  ;;  %v1900_v30 = vsel %vm726_vm3, %v1886_v26, -inf }
 0xe16   :  { %1907 = vmax.xlane.f32.xlu1 %v1906_v27  ;;  %v1868_v28 = vpop.f32.mrb[44].mxu1 }
 0xe17   :  { %v1881_v22 = vmul.f32 0.35355338, %v1868_v28  ;;  %v3044_v29 = vpop.f32.mrb[45].mxu1 }
 0xe18   :  { %1901 = vmax.xlane.f32.xlu0 %v1900_v30  ;;  %v1871_v50 = vpop.f32.mrb[46].mxu1 }
 0xe19   :  { %v1882_v32 = vmul.f32 0.35355338, %v1871_v50  ;;  %v3045_v34 = vpop.f32.mrb[47].mxu1  ;;  %v1889_v58 = vadd.f32 %v1881_v22, %v3876_v18 }
 0xe1b   :  { %v4095_v57 = vadd.f32 %v1882_v32, %v3871_v17  ;;  %v1909_v40 = vsel %vm726_vm3, %v1889_v58, -inf }
 0xe1c   :  { %1904 = vmax.xlane.f32.xlu0 %v1903_v35 }
 0xe1d   :  { %v1912_v36 = vsel %vm726_vm3, %v4095_v57, -inf }
 0xe1e   :  { %1913 = vmax.xlane.f32.xlu1 %v1912_v36 }
 0xe20   :  { %1910 = vmax.xlane.f32.xlu0 %v1909_v40 }
 0xe2e   :  { %v1893_v8 = vpop.xlane.xlu0 %1892 }
 0xe2f   :  { %v1915_v42 = vsub.f32 %v1883_v5, %v1893_v8 }
 0xe30   :  { %v1896_v51 = vpop.xlane.xlu1 %1895 }
 0xe31   :  { %v1923_v45 = vmul.f32 1.442695, %v1915_v42  ;;  %v1916_v47 = vsub.f32 %v1884_v7, %v1896_v51 }
 0xe33   :  { %3249 = vpow2.f32 %v1923_v45  ;;  %v1925_v48 = vmul.f32 1.442695, %v1916_v47 }
 0xe35   :  { %3251 = vpow2.f32 %v1925_v48 }
 0xe3d   :  { %v3250_v17 = vpop.eup %3249 }
 0xe3e   :  { %v1939_v44 = vsel %vm726_vm3, %v3250_v17, 0.0 }
 0xe3f   :  { %v3252_v18 = vpop.eup %3251  ;;  %1940 = vadd.xlane.f32.xlu0 %v1939_v44 }
 0xe40   :  { %v1942_v49 = vsel %vm726_vm3, %v3252_v18, 0.0 }
 0xe41   :  { %1943 = vadd.xlane.f32.xlu1 %v1942_v49 }
 0xea1   :  { %v1899_v59 = vpop.xlane.xlu0 %1898 }
 0xea2   :  { %v1917_v60 = vsub.f32 %v1885_v33, %v1899_v59 }
 0xea3   :  { %v1908_v61 = vpop.xlane.xlu1 %1907 }
 0xea4   :  { %v1927_v63 = vmul.f32 1.442695, %v1917_v60  ;;  %v1920_v46 = vsub.f32 %v1888_v25, %v1908_v61 }
 0xea5   :  { %v1902_v52 = vpop.xlane.xlu0 %1901 }
 0xea6   :  { %3253 = vpow2.f32 %v1927_v63  ;;  %v1918_v53 = vsub.f32 %v1886_v26, %v1902_v52  ;;  %v1933_v54 = vmul.f32 1.442695, %v1920_v46  ;;  %v3187_v46 = vld [vmem:[%s4236_s6 + $0x10] sm:$0xff]  }
 0xea8   :  { %v1929_v55 = vmul.f32 1.442695, %v1918_v53 }
 0xea9   :  { %v1905_v56 = vpop.xlane.xlu0 %1904 }
 0xeaa   :  { %3255 = vpow2.f32 %v1929_v55  ;;  %v1919_v62 = vsub.f32 %v1887_v31, %v1905_v56 }
 0xeab   :  { %3257 = vpow2.f32 %v1933_v54  ;;  %v1914_v15 = vpop.xlane.xlu1 %1913 }
 0xeac   :  { %v1931_v37 = vmul.f32 1.442695, %v1919_v62  ;;  %v1922_v23 = vsub.f32 %v4095_v57, %v1914_v15 }
 0xead   :  { %v1911_v38 = vpop.xlane.xlu0 %1910 }
 0xeae   :  { %3259 = vpow2.f32 %v1931_v37  ;;  %v1921_v2 = vsub.f32 %v1889_v58, %v1911_v38  ;;  %v1937_v25 = vmul.f32 1.442695, %v1922_v23 }
 0xeb0   :  { %v3254_v3 = vpop.eup %3253  ;;  %v1935_v4 = vmul.f32 1.442695, %v1921_v2 }
 0xeb1   :  { %v1945_v5 = vsel %vm726_vm3, %v3254_v3, 0.0 }
 0xeb2   :  { %3261 = vpow2.f32 %v1935_v4  ;;  %1946 = vadd.xlane.f32.xlu0 %v1945_v5  ;;  %v3188_v4 = vld [vmem:[%s4236_s6 + $0x18] sm:$0xff]   ;;  %s3472_s6 = smov [#allocation13]  }
 0xeb4   :  { %v3256_v6 = vpop.eup %3255 }
 0xeb5   :  { %v1948_v7 = vsel %vm726_vm3, %v3256_v6, 0.0  ;;  %v3258_v9 = vpop.eup %3257 }
 0xeb6   :  { %1949 = vadd.xlane.f32.xlu1 %v1948_v7  ;;  %v1954_v12 = vsel %vm726_vm3, %v3258_v9, 0.0 }
 0xeb8   :  { %v3260_v11 = vpop.eup %3259 }
 0xeb9   :  { %v1951_v41 = vsel %vm726_vm3, %v3260_v11, 0.0 }
 0xeba   :  { %1952 = vadd.xlane.f32.xlu0 %v1951_v41  ;;  %1955 = vadd.xlane.f32.xlu1 %v1954_v12 }
 0xebc   :  { %v3262_v13 = vpop.eup %3261 }
 0xebd   :  { %v1957_v14 = vsel %vm726_vm3, %v3262_v13, 0.0 }
 0xebe   :  { %1958 = vadd.xlane.f32.xlu0 %v1957_v14 }
 0xecb   :  { %2075 = vrot.lane.b32.xlu1 %v4044_v20, %s3468_s14  ;;  %s4269_s14 = sld [smem:[#allocation24_spill]] }
 0xecc   :  { %v1941_v43 = vpop.xlane.xlu0 %1940 }
 0xecd   :  { %3263 = vrcp.f32 %v1941_v43 }
 0xece   :  { %v1944_v16 = vpop.xlane.xlu1 %1943 }
 0xecf   :  { %3265 = vrcp.f32 %v1944_v16 }
 0xed0   :  { %3267 = vpow2.f32 %v1937_v25 }
 0xed4   :  { %2027 = vrot.lane.b32.xlu0 %v4044_v20, %s3467_s13 }
 0xed7   :  { %v3264_v19 = vpop.eup %3263 }
 0xed8   :  { %v1971_v33 = vmul.f32 %v3264_v19, %v3250_v17 }
 0xed9   :  { %v3266_v21 = vpop.eup %3265 }
 0xeda   :  { %v1972_v24 = vmul.f32 %v3266_v21, %v3252_v18  ;;  %v3268_v26 = vpop.eup %3267 }
 0xedb   :  { %v1960_v27 = vsel %vm726_vm3, %v3268_v26, 0.0 }
 0xedc   :  { %v1979_v39 = vpack.c.bf16 %v1972_v24, %v1971_v33 }
 0xede   :  { %3049 = vmatmul.mubr.msk.bf16.vlgmr.msra.gmra.mrb[52].mxu0 %vm726_vm3, %v1979_v39 }
 0xedf   :  { %3060 = vmatprep.mubr.msk.bf16.mxu0 %vm3466_vm1, %v3465_v10 }
 0xeef   :  { %1961 = vadd.xlane.f32.xlu1 %v1960_v27 }
 0xf00   :  { %2123 = vrot.lane.b32.xlu1 %v4044_v20, %s3469_s23 }
 0xf3f   :  { %v1947_v28 = vpop.xlane.xlu0 %1946 }
 0xf40   :  { %3269 = vrcp.f32 %v1947_v28 }
 0xf43   :  { %v1950_v22 = vpop.xlane.xlu1 %1949 }
 0xf44   :  { %3271 = vrcp.f32 %v1950_v22 }
 0xf47   :  { %v1953_v29 = vpop.xlane.xlu0 %1952  ;;  %v1956_v30 = vpop.xlane.xlu1 %1955 }
 0xf48   :  { %3273 = vrcp.f32 %v1953_v29 }
 0xf49   :  { %3275 = vrcp.f32 %v1956_v30 }
 0xf4a   :  { %v3270_v32 = vpop.eup %3269 }
 0xf4b   :  { %v1959_v31 = vpop.xlane.xlu0 %1958  ;;  %v2076_v50 = vpop.permute.xlu1 %2075  ;;  %v1973_v35 = vmul.f32 %v3270_v32, %v3254_v3 }
 0xf4c   :  { %3059 = vmatpush3.bf16.msra.mxu0 %v2076_v50  ;;  %3277 = vrcp.f32 %v1959_v31 }
 0xf4d   :  { %3070 = vmatprep.subr.bf16.mxu0 %v3465_v10 }
 0xf4e   :  { %v3272_v34 = vpop.eup %3271 }
 0xf4f   :  { %v1974_v57 = vmul.f32 %v3272_v34, %v3256_v6  ;;  %v2028_v58 = vpop.permute.xlu0 %2027 }
 0xf50   :  { %3053 = vmatpush3.bf16.msra.mxu1 %v2028_v58 }
 0xf51   :  { %v2025_v20 = vpack.c.bf16 %v1974_v57, %v1973_v35  ;;  %3064 = vmatprep.subr.bf16.mxu1 %v3465_v10 }
 0xf52   :  { %v3274_v36 = vpop.eup %3273 }
 0xf53   :  { %v3276_v40 = vpop.eup %3275  ;;  %v1975_v8 = vmul.f32 %v3274_v36, %v3260_v11  ;;  %3055 = vmatmul.mubr.msk.bf16.vlgmr.msra.gmra.mrb[48].mxu1 %vm726_vm3, %v2025_v20  ;;  %v3191_v36 = vld [vmem:[%s4241_s11 + $0x40] sm:$0xff]  }
 0xf54   :  { %v1976_v42 = vmul.f32 %v3276_v40, %v3258_v9  ;;  %3066 = vmatprep.mubr.msk.bf16.mxu1 %vm3466_vm1, %v3465_v10  ;;  %v3192_v40 = vld [vmem:[%s4241_s11 + $0x48] sm:$0xff]  }
 0xf56   :  { %v2074_v51 = vpack.c.bf16 %v1976_v42, %v1975_v8  ;;  %v3278_v48 = vpop.eup %3277 }
 0xf57   :  { %v1977_v44 = vmul.f32 %v3278_v48, %v3262_v13 }
 0xf58   :  { %3061 = vmatmul.mubr.msk.bf16.vlgmr.msra.gmra.mrb[56].mxu0 %vm726_vm3, %v2074_v51 }
 0xf59   :  { %3074 = vmatprep.mubr.msk.bf16.mxu0 %vm3466_vm1, %v3465_v10  ;;  %3071 = vmatpush3.bf16.msra.mxu0 %v3187_v46 }
 0xf5a   :  { %3072 = vmatprep.subr.bf16.mxu0 %v3465_v10 }
 0xf5d   :  { %3073 = vmatpush3.bf16.msra.mxu0 %v3188_v4 }
 0xf5e   :  { %3086 = vmatprep.subr.bf16.mxu0 %v3465_v10 }
 0xf7c   :  { %v1962_v45 = vpop.xlane.xlu1 %1961 }
 0xf7d   :  { %3279 = vrcp.f32 %v1962_v45 }
 0xf80   :  { %v2124_v47 = vpop.permute.xlu1 %2123 }
 0xf81   :  { %3065 = vmatpush3.bf16.msra.mxu1 %v2124_v47 }
 0xf82   :  { %3078 = vmatprep.subr.bf16.mxu1 %v3465_v10 }
 0xf87   :  { %v3280_v17 = vpop.eup %3279 }
 0xf88   :  { %v1978_v18 = vmul.f32 %v3280_v17, %v3268_v26 }
 0xf8a   :  { %v2122_v49 = vpack.c.bf16 %v1978_v18, %v1977_v44 }
 0xf8c   :  { %3067 = vmatmul.mubr.msk.bf16.vlgmr.msra.gmra.mrb[52].mxu1 %vm726_vm3, %v2122_v49 }
 0xf8d   :  { %3082 = vmatprep.mubr.msk.bf16.mxu1 %vm3466_vm1, %v3465_v10 }
 0xfb1   :  { %v2018_v59 = vpop.f32.mrb[52].mxu0 }
 0xfb2   :  { %v3050_v60 = vpop.f32.mrb[53].mxu0 }
 0xfb3   :  { %v2021_v61 = vpop.f32.mrb[54].mxu0 }
 0xfb4   :  { %v3051_v63 = vpop.f32.mrb[55].mxu0 }
0x1026   :  { %v2067_v52 = vpop.f32.mrb[48].mxu1 }
0x1027   :  { %v3056_v53 = vpop.f32.mrb[49].mxu1 }
0x1028   :  { %v2070_v54 = vpop.f32.mrb[50].mxu1 }
0x1029   :  { %v3146_v55 = vpack.i.bf16 %v2070_v54, %v2067_v52  ;;  %v3057_v56 = vpop.f32.mrb[51].mxu1  ;;  %v2723_v54 = vld [vmem:[#allocation7 + $0x1] ss:$0 sm:$0xff] }
0x102b   :  { %v2115_v62 = vpop.f32.mrb[56].mxu0  ;;  %3147 = vrot.lane.b32.xlu1 %v3146_v55, %s3470_s4 }
0x102c   :  { %v3062_v37 = vpop.f32.mrb[57].mxu0 }
0x102d   :  { %v2118_v38 = vpop.f32.mrb[58].mxu0 }
0x102e   :  { %v3151_v2 = vpack.i.bf16 %v2118_v38, %v2115_v62  ;;  %v3063_v3 = vpop.f32.mrb[59].mxu0  ;;  %v2724_v38 = vld [vmem:[#allocation8 + $0x1] ss:$0 sm:$0xff] }
0x1030   :  { %3152 = vrot.lane.b32.xlu0 %v3151_v2, %s3459_s0  ;;  %s2627_s0 = sshll.u32 %s3472_s6, 4  ;;  %s2628_s0 = int_to_ptr.vmem [resolvable:$true] %s2627_s0 }
0x1031   :  { %p3430_p7 = scmp.lt.s32.totalorder %s2628_s0, %s2628_s0 }
0x105f   :  { %v2163_v5 = vpop.f32.mrb[52].mxu1 }
0x1060   :  { %v3068_v6 = vpop.f32.mrb[53].mxu1 }
0x1061   :  { %v2166_v7 = vpop.f32.mrb[54].mxu1  ;;  %v3193_v6 = vld [vmem:[%s4241_s11 + $0x50] sm:$0xff]  }
0x1062   :  { %v3156_v9 = vpack.i.bf16 %v2166_v7, %v2163_v5  ;;  %v3069_v11 = vpop.f32.mrb[55].mxu1  ;;  %v3194_v7 = vld [vmem:[%s4241_s11 + $0x58] sm:$0xff]  }
0x1063   :  { %v3196_v11 = vld [vmem:[%s4241_s11 + $0x68] sm:$0xff]  }
0x1064   :  { %3157 = vrot.lane.b32.xlu1 %v3156_v9, %s3471_s8  ;;  %v3195_v9 = vld [vmem:[%s4241_s11 + $0x60] sm:$0xff]  }
0x109d   :  { %v3148_v41 = vpop.permute.xlu1 %3147 }
0x109e   :  { %v3150_v13 = vunpack.i.h.bf16 %v3148_v41  ;;  %v3149_v14 = vunpack.i.l.bf16 %v3148_v41  ;;  %v3197_v41 = vld [vmem:[%s4241_s11 + $0x70] sm:$0xff]  }
0x10a0   :  { %v2195_v19 = vsel %vm507_vm2, %v2021_v61, %v3150_v13  ;;  %v2194_v21 = vsel %vm507_vm2, %v2018_v59, %v3149_v14  ;;  %v2729_v13 = vld [vmem:[#allocation10 + $0x1] ss:$0 sm:$0xff] }
0x10a2   :  { %v3153_v12 = vpop.permute.xlu0 %3152 }
0x10a3   :  { %v3155_v15 = vunpack.i.h.bf16 %v3153_v12  ;;  %v3154_v43 = vunpack.i.l.bf16 %v3153_v12  ;;  %v3198_v12 = vld [vmem:[%s4241_s11 + $0x78] sm:$0xff]  }
0x10a5   :  { %v2196_v24 = vsel %vm726_vm3, %v2194_v21, %v3154_v43  ;;  %v2197_v39 = vsel %vm726_vm3, %v2195_v19, %v3155_v15 }
0x10d6   :  { %v3158_v16 = vpop.permute.xlu1 %3157 }
0x10d7   :  { %v3160_v23 = vunpack.i.h.bf16 %v3158_v16  ;;  %v3159_v33 = vunpack.i.l.bf16 %v3158_v16 }
0x10d9   :  { %v2199_v25 = vsel %vm1034_vm4, %v2197_v39, %v3160_v23  ;;  %v2198_v26 = vsel %vm1034_vm4, %v2196_v24, %v3159_v33 }
0x10da   :  { %v2200_v27 = vpack.c.bf16 %v2199_v25, %v2198_v26 }
0x10dc   :  { %3075 = vmatmul.mubr.msk.bf16.vlgmr.msra.gmra.mrb[60].mxu0 %vm169_vm0, %v2200_v27 }
0x10dd   :  { %3102 = vmatprep.mubr.msk.bf16.mxu0 %vm3466_vm1, %v3465_v10  ;;  %3087 = vmatpush3.bf16.msra.mxu0 %v3191_v36 }
0x10de   :  { %3088 = vmatprep.subr.bf16.mxu0 %v3465_v10 }
0x10e1   :  { %3089 = vmatpush3.bf16.msra.mxu0 %v3192_v40 }
0x10e2   :  { %3090 = vmatprep.subr.bf16.mxu0 %v3465_v10 }
0x10e5   :  { %3091 = vmatpush3.bf16.msra.mxu0 %v3193_v6 }
0x10e6   :  { %3092 = vmatprep.subr.bf16.mxu0 %v3465_v10 }
0x10e9   :  { %3093 = vmatpush3.bf16.msra.mxu0 %v3194_v7 }
0x10ea   :  { %3094 = vmatprep.subr.bf16.mxu0 %v3465_v10 }
0x10ed   :  { %3095 = vmatpush3.bf16.msra.mxu0 %v3195_v9 }
0x10ee   :  { %3096 = vmatprep.subr.bf16.mxu0 %v3465_v10 }
0x10f1   :  { %3097 = vmatpush3.bf16.msra.mxu0 %v3196_v11 }
0x10f2   :  { %3098 = vmatprep.subr.bf16.mxu0 %v3465_v10 }
0x10f5   :  { %3099 = vmatpush3.bf16.msra.mxu0 %v3197_v41 }
0x10f6   :  { %3100 = vmatprep.subr.bf16.mxu0 %v3465_v10 }
0x10f9   :  { %3101 = vmatpush3.bf16.msra.mxu0 %v3198_v12 }
0x11af   :  { %v2255_v28 = vpop.f32.mrb[60].mxu0 }
0x11b0   :  { %v2262_v22 = vadd.f32 %v2255_v28, %v4003_v0  ;;  %v3076_v29 = vpop.f32.mrb[61].mxu0  ;;  %v3189_v0 = vld [vmem:[%s4239_s9 + $0x10] sm:$0xff]  }
0x11b1   :  { %v2258_v30 = vpop.f32.mrb[62].mxu0  ;;  %3079 = vmatpush3.bf16.msra.mxu1 %v3189_v0 }
0x11b2   :  { %v2263_v31 = vadd.f32 %v2258_v30, %v4005_v1  ;;  %v3077_v50 = vpop.f32.mrb[63].mxu0  ;;  %v2268_v32 = vsel %vm169_vm0, %v2262_v22, 0.0  ;;  %v2274_v34 = vmul.f32 %v2262_v22, %v2262_v22  ;;  %v3190_v1 = vld [vmem:[%s4239_s9 + $0x18] sm:$0xff]   ;;  %3080 = vmatprep.subr.bf16.mxu1 %v3465_v10 }
0x11b3   :  { %2269 = vadd.xlane.f32.xlu0 %v2268_v32 }
0x11b4   :  { %v2271_v35 = vsel %vm169_vm0, %v2263_v31, 0.0  ;;  %v2276_v57 = vsel %vm169_vm0, %v2274_v34, 0.0  ;;  %v2275_v58 = vmul.f32 %v2263_v31, %v2263_v31 }
0x11b5   :  { %2272 = vadd.xlane.f32.xlu1 %v2271_v35  ;;  %3081 = vmatpush3.bf16.msra.mxu1 %v3190_v1 }
0x11b6   :  { %v2279_v20 = vsel %vm169_vm0, %v2275_v58, 0.0  ;;  %3106 = vmatprep.subr.bf16.mxu1 %v3465_v10 }
0x11b7   :  { %2277 = vadd.xlane.f32.xlu0 %v2276_v57 }
0x11bb   :  { %2280 = vadd.xlane.f32.xlu0 %v2279_v20 }
0x1240   :  { %v2270_v8 = vpop.xlane.xlu0 %2269 }
0x1241   :  { %v2282_v42 = vmul.f32 0.03125, %v2270_v8 }
0x1242   :  { %v2273_v51 = vpop.xlane.xlu1 %2272 }
0x1243   :  { %v2286_v47 = vmul.f32 %v2282_v42, %v2282_v42  ;;  %v2283_v48 = vmul.f32 0.03125, %v2273_v51  ;;  %v2290_v46 = vsub.f32 %v2262_v22, %v2282_v42 }
0x1244   :  { %v2278_v45 = vpop.xlane.xlu0 %2277 }
0x1245   :  { %v2284_v17 = vmul.f32 0.03125, %v2278_v45  ;;  %v2287_v49 = vmul.f32 %v2283_v48, %v2283_v48  ;;  %v2291_v55 = vsub.f32 %v2263_v31, %v2283_v48  ;;  %v2749_v31 = vld [vmem:[#allocation11 + $0x1] ss:$0 sm:$0xff]  ;;  %v3199_v45 = vld [vmem:[%s4249_s19] sm:$0xff]  }
0x1247   :  { %v2288_v44 = vsub.f32 %v2284_v17, %v2286_v47  ;;  %v3200_v47 = vld [vmem:[%s4249_s19 + $0x8] sm:$0xff]  }
0x1248   :  { %v2281_v18 = vpop.xlane.xlu0 %2280 }
0x1249   :  { %v2292_v59 = vadd.f32 1e-05, %v2288_v44  ;;  %v2285_v60 = vmul.f32 0.03125, %v2281_v18 }
0x124b   :  { %3281 = vrsqrt.f32 %v2292_v59  ;;  %v2289_v61 = vsub.f32 %v2285_v60, %v2287_v49 }
0x124d   :  { %v2293_v63 = vadd.f32 1e-05, %v2289_v61 }
0x124f   :  { %3283 = vrsqrt.f32 %v2293_v63 }
0x1255   :  { %v3282_v52 = vpop.eup %3281 }
0x1256   :  { %v2296_v53 = vmul.f32 %v3282_v52, %v2290_v46 }
0x1258   :  { %v2304_v37 = vmul.f32 %v2723_v54, %v2296_v53 }
0x1259   :  { %v3284_v56 = vpop.eup %3283 }
0x125a   :  { %v2297_v62 = vmul.f32 %v3284_v56, %v2291_v55  ;;  %v2312_v3 = vadd.f32 %v2724_v38, %v2304_v37 }
0x125c   :  { %v2305_v2 = vmul.f32 %v2723_v54, %v2297_v62 }
0x125e   :  { %v2313_v4 = vadd.f32 %v2724_v38, %v2305_v2 }
0x1260   :  { %v2314_v5 = vpack.c.bf16 %v2313_v4, %v2312_v3 }
0x1262   :  { %3083 = vmatmul.mubr.msk.bf16.vlgmr.msra.gmra.mrb[56].mxu1 %vm169_vm0, %v2314_v5  ;;  %v2759_v5 = vld [vmem:[%s4269_s14] ss:$0 sm:$0xff] }
0x1263   :  { %3110 = vmatprep.mubr.msk.bf16.mxu1 %vm3466_vm1, %v3465_v10  ;;  %3107 = vmatpush3.bf16.msra.mxu1 %v3199_v45 }
0x1264   :  { %3108 = vmatprep.subr.bf16.mxu1 %v3465_v10  ;;  %v2758_v10 = vld [vmem:[%s4247_s17] ss:$0 sm:$0xff]  ;;  %s3425_s17 = scalar_lea.vmem %s2628_s0, 256 }
0x1265   :  { %p3426_p6 = scmp.ne.s32.totalorder %s2628_s0, %s3425_s17  ;;  %p3431_p8 = scmp.lt.s32.totalorder %s3425_s17, %s3425_s17 }
0x1267   :  { %3109 = vmatpush3.bf16.msra.mxu1 %v3200_v47  ;;  %p3432_p9 = por %p3431_p8, %p3430_p7 }
0x1269   :  { %p3433_p10 = pnand %p3432_p9, %p3426_p6 }
0x1335   :  { %v2377_v14 = vpop.f32.mrb[56].mxu1 }
0x1336   :  { %v2378_v15 = vadd.f32 %v2729_v13, %v2377_v14  ;;  %v3084_v43 = vpop.f32.mrb[57].mxu1 }
0x1337   :  { %v2380_v16 = vpop.f32.mrb[58].mxu1 }
0x1338   :  { %v2386_v19 = vmul.f32 0.70710677, %v2378_v15  ;;  %v2381_v21 = vadd.f32 %v2729_v13, %v2380_v16  ;;  %v3085_v23 = vpop.f32.mrb[59].mxu1  ;;  %v2384_v26 = vmul.f32 0.5, %v2378_v15 }
0x133a   :  { %3285 = verf.f32 %v2386_v19  ;;  %v2387_v33 = vmul.f32 0.70710677, %v2381_v21  ;;  %v2385_v27 = vmul.f32 0.5, %v2381_v21 }
0x133c   :  { %3287 = verf.f32 %v2387_v33 }
0x1344   :  { %v3286_v24 = vpop.eup %3285 }
0x1345   :  { %v2390_v39 = vadd.f32 1.0, %v3286_v24 }
0x1346   :  { %v3288_v25 = vpop.eup %3287 }
0x1347   :  { %v2391_v28 = vadd.f32 1.0, %v3288_v25  ;;  %v2392_v22 = vmul.f32 %v2390_v39, %v2384_v26 }
0x1349   :  { %v2393_v29 = vmul.f32 %v2391_v28, %v2385_v27 }
0x134b   :  { %v2394_v30 = vpack.c.bf16 %v2393_v29, %v2392_v22 }
0x134d   :  { %3103 = vmatmul.mubr.bf16.vlgmr.msra.gmra.mrb[64].mxu0 %v2394_v30 }
0x1420   :  { %v2502_v50 = vpop.f32.mrb[64].mxu0 }
0x1421   :  { %v2503_v32 = vadd.f32 %v2749_v31, %v2502_v50  ;;  %v3104_v34 = vpop.f32.mrb[65].mxu0 }
0x1422   :  { %v2505_v35 = vpop.f32.mrb[66].mxu0 }
0x1423   :  { %v2509_v57 = vadd.f32 %v2503_v32, %v2312_v3  ;;  %v2506_v58 = vadd.f32 %v2749_v31, %v2505_v35  ;;  %v3105_v20 = vpop.f32.mrb[67].mxu0 }
0x1425   :  { %v2510_v0 = vadd.f32 %v2506_v58, %v2313_v4  ;;  %v2513_v1 = vsel %vm169_vm0, %v2509_v57, 0.0  ;;  %v2519_v36 = vmul.f32 %v2509_v57, %v2509_v57 }
0x1426   :  { %2514 = vadd.xlane.f32.xlu0 %v2513_v1 }
0x1427   :  { %v2516_v40 = vsel %vm169_vm0, %v2510_v0, 0.0  ;;  %v2520_v8 = vmul.f32 %v2510_v0, %v2510_v0  ;;  %v2521_v42 = vsel %vm169_vm0, %v2519_v36, 0.0 }
0x1428   :  { %2517 = vadd.xlane.f32.xlu1 %v2516_v40 }
0x1429   :  { %v2524_v51 = vsel %vm169_vm0, %v2520_v8, 0.0 }
0x142a   :  { %2522 = vadd.xlane.f32.xlu0 %v2521_v42 }
0x142c   :  { %2525 = vadd.xlane.f32.xlu1 %v2524_v51 }
0x14b3   :  { %v2515_v48 = vpop.xlane.xlu0 %2514 }
0x14b4   :  { %v2527_v17 = vmul.f32 0.03125, %v2515_v48 }
0x14b5   :  { %v2518_v44 = vpop.xlane.xlu1 %2517 }
0x14b6   :  { %v2528_v18 = vmul.f32 0.03125, %v2518_v44  ;;  %v2531_v59 = vmul.f32 %v2527_v17, %v2527_v17  ;;  %v2535_v56 = vsub.f32 %v2509_v57, %v2527_v17 }
0x14b7   :  { %v2523_v49 = vpop.xlane.xlu0 %2522 }
0x14b8   :  { %v2529_v60 = vmul.f32 0.03125, %v2523_v49  ;;  %v2532_v63 = vmul.f32 %v2528_v18, %v2528_v18  ;;  %v2536_v37 = vsub.f32 %v2510_v0, %v2528_v18 }
0x14b9   :  { %v2526_v61 = vpop.xlane.xlu1 %2525 }
0x14ba   :  { %v2533_v46 = vsub.f32 %v2529_v60, %v2531_v59  ;;  %v2530_v52 = vmul.f32 0.03125, %v2526_v61 }
0x14bc   :  { %v2537_v53 = vadd.f32 1e-05, %v2533_v46  ;;  %v2534_v54 = vsub.f32 %v2530_v52, %v2532_v63 }
0x14be   :  { %3289 = vrsqrt.f32 %v2537_v53  ;;  %v2538_v55 = vadd.f32 1e-05, %v2534_v54 }
0x14c0   :  { %3291 = vrsqrt.f32 %v2538_v55 }
0x14c8   :  { %v3290_v62 = vpop.eup %3289 }
0x14c9   :  { %v2541_v38 = vmul.f32 %v3290_v62, %v2535_v56 }
0x14ca   :  { %v3292_v2 = vpop.eup %3291 }
0x14cb   :  { %v2549_v3 = vmul.f32 %v2758_v10, %v2541_v38  ;;  %v2542_v4 = vmul.f32 %v3292_v2, %v2536_v37 }
0x14cd   :  { %v2550_v6 = vmul.f32 %v2758_v10, %v2542_v4  ;;  %v2557_v7 = vadd.f32 %v2759_v5, %v2549_v3 }
0x14cf   :  { %v2558_v9 = vadd.f32 %v2759_v5, %v2550_v6 }
0x14d1   :  { %v2559_v11 = vpack.c.bf16 %v2558_v9, %v2557_v7 }
0x14d3   :  { %3111 = vmatmul.mubr.msk.bf16.vlgmr.msra.gmra.mrb[60].mxu1 %vm169_vm0, %v2559_v11 }
0x15a6   :  { %v2613_v41 = vpop.f32.mrb[60].mxu1 }
0x15a7   :  { %2620 = vst [vmem:[#allocation13] sm:$0xff] %v2613_v41  ;;  %v3112_v12 = vpop.f32.mrb[61].mxu1 }
0x15a8   :  { %v2616_v13 = vpop.f32.mrb[62].mxu1 }
0x15a9   :  { %2621 = vst [vmem:[#allocation13 + $0x8] sm:$0xff] %v2616_v13  ;;  %v3113_v14 = vpop.f32.mrb[63].mxu1 }
0x15aa   :  { %3436 = shalt.err (!%p3433_p10)
}
0x15ab   :  { %s4270_s27 = sld [smem:[#allocation25_spill]] }
0x15b1   :  { %s3437_s28 = scalar_lea.hbm %s4270_s27, 256 }
0x15b2   :  { %p3438_p11 = scmp.ne.s32.totalorder %s4270_s27, %s3437_s28  ;;  %p3441_p12 = scmp.lt.u32.totalorder %s3437_s28, %s4270_s27 }
0x15b4   :  { %p3443_p13 = pnand %p3441_p12, %p3438_p11 }
0x15b6   :  { %3446 = shalt.err (!%p3443_p13)
}
0x15b7   :  { %s3473_s10 = smov 128  }
0x15b8   :  { %2633 = dma.vmem_to_hbm [thread:$0]  %s2628_s0, 256, %s4270_s27, [#allocation4], %s3473_s10, %s3473_s10, %s3470_s4  }
0x15b9   :  { %3455 = dma.done.wait [#allocation4], 256  }
0x15ba   :  { %3456 = vsyncadd [#allocation4], 4294967040 }
0x15bb   :  { %2637 = vsyncpa [#allocation3], 1 }
0x15bc   :  { %2638 = vsyncpa [#allocation6], 1 }
0x15bd   :  { %2639 = vsyncpa [#allocation9], 1 }
0x15be   :  { %2640 = vsyncpa [#allocation12], 1 }
0x15bf   :  { %2641 = vsyncpa [#allocation4], 1 }

</bundles_post_ra>
